<compile_context>
chip_gen: v6e
topology: v6e:2x2x1
jax: 0.10.0
libtpu: 0.0.40
codegen_flags: <defaults>
</compile_context>

<pallas_src>
import functools
import math

import numpy as np
import jax
import jax.numpy as jnp
from jax import lax
from jax.experimental import pallas as pl
from jax.experimental.pallas import tpu as pltpu

_SQRT_HALF = 0.7071067811865476
_RES_SCALE = 1.0 / 1.414          # matches the PyTorch `out / 1.414`
_STATS_ROWS = 8                   # sublane-padded rows per per-chunk partial-stat block


# --------------------------------------------------------------------------- #
# Hardware / config helpers
# --------------------------------------------------------------------------- #
def _itemsize(dt):
    return np.dtype(dt).itemsize


def _vmem_capacity_bytes():
    """Generation-aware VMEM capacity (128 MiB v5e/v6e, 64 MiB v7x)."""
    try:
        info = pltpu.get_tpu_info()
        for name in ("vmem_capacity_bytes", "vmem_size_bytes", "vmem_bytes"):
            cap = getattr(info, name, None)
            if cap:
                return int(cap)
    except Exception:
        pass
    return 64 << 20               # conservative (v7x-sized) fallback


def _mosaic_params(dimension_semantics, est_bytes):
    cap = _vmem_capacity_bytes()
    limit = int(min(max(3 * est_bytes, 32 << 20), int(cap * 0.75)))
    return pltpu.CompilerParams(dimension_semantics=dimension_semantics,
                                vmem_limit_bytes=limit)


def _blocks_bytes(entries):
    return int(sum(int(np.prod(s)) * _itemsize(d) for s, d in entries))


@functools.lru_cache(maxsize=None)
def _single_buffer_supported():
    """Probe pl.Buffered(1) (single-buffered grid-invariant operands).

    Runs one tiny kernel; falls back to plain (double-buffered) BlockSpecs on
    any failure so this optimization can never break the main kernels.
    """
    try:
        inv = pl.BlockSpec((8, 128), lambda i: (0, 0),
                           pipeline_mode=pl.Buffered(1))

        def _k(a_ref, b_ref, o_ref):
            o_ref[...] = a_ref[...] + b_ref[...]

        fn = pl.pallas_call(
            _k, grid=(2,),
            in_specs=[inv, pl.BlockSpec((8, 128), lambda i: (i, 0))],
            out_specs=pl.BlockSpec((8, 128), lambda i: (i, 0)),
            out_shape=jax.ShapeDtypeStruct((16, 128), jnp.float32))
        out = jax.block_until_ready(fn(jnp.ones((8, 128), jnp.float32),
                                       jnp.ones((16, 128), jnp.float32)))
        return bool(jnp.all(out == 2.0))
    except Exception:
        return False


def _pick_batch_tile(B, in_fs, out_fs, compute_dtype, inter_dtype, vmem_cap):
    """Largest batch tile whose double-buffered working set fits a VMEM budget."""
    budget = int(vmem_cap * 0.4)
    w_it = _itemsize(compute_dtype)
    i_it = _itemsize(inter_dtype)
    resident = 2 * w_it * (in_fs * out_fs + out_fs * out_fs) + 64 * out_fs * 4
    for bt in (1024, 512, 256, 128, 64, 32, 16, 8):
        if bt > B or B % bt != 0:
            continue
        streamed = 2 * (4 * bt * in_fs + 2 * i_it * bt * out_fs) + 4 * 64 * out_fs
        if resident + streamed <= budget:
            return bt
    return B


def _fused_live_bytes(B, in_fs, out_fs, compute_dtype):
    """VMEM live-bytes estimate of the un-gridded fused kernel (I/O + temporaries)."""
    w_it = _itemsize(compute_dtype)
    return (4 * B * in_fs + 4 * B * out_fs
            + w_it * (in_fs * out_fs + out_fs * out_fs)
            + 6 * 4 * B * out_fs            # live f32 temporaries in the body
            + 12 * 4 * out_fs)


# --------------------------------------------------------------------------- #
# In-kernel building blocks
# --------------------------------------------------------------------------- #
def _gelu_exact(x):
    # nn.GELU() default: exact erf-based GELU.
    return 0.5 * x * (1.0 + lax.erf(x * _SQRT_HALF))


def _bn_apply(h, s, q, gamma, beta, inv_n, eps):
    # Training-mode BatchNorm1d with biased variance, from accumulated sums.
    m = s * inv_n
    var = jnp.maximum(q * inv_n - m * m, 0.0)   # clamp cancellation noise
    return (h - m) * lax.rsqrt(var + eps) * gamma + beta


def _col_sums(h):
    # Per-feature sum and sum-of-squares via an MXU ones-matmul (keeps XLU free).
    ones = jnp.ones((1, h.shape[0]), jnp.float32)
    s = jnp.dot(ones, h, preferred_element_type=jnp.float32)        # (1, F)
    q = jnp.dot(ones, h * h, preferred_element_type=jnp.float32)    # (1, F)
    return s, q


def _fold_stats(block, nc):
    # block: (nc * _STATS_ROWS, F); each group of _STATS_ROWS rows holds the
    # identical per-chunk partial sums -> pick row 0 of each group (exact).
    total = block[0:1, :]
    for c in range(1, nc):
        total = total + block[c * _STATS_ROWS:c * _STATS_ROWS + 1, :]
    return total


def _matmul(x, w, compute_dtype):
    # x: (bt, K) any dtype, w: (K, N) already in compute_dtype. f32 accumulation.
    return jnp.dot(x.astype(compute_dtype), w, preferred_element_type=jnp.float32)


# --------------------------------------------------------------------------- #
# Kernels
# --------------------------------------------------------------------------- #
def _fused_kernel(x_ref, w1_ref, b1_ref, g1_ref, be1_ref, w2_ref, b2_ref,
                  g2_ref, be2_ref, out_ref, *, is_res, same_fs, is_out, eps,
                  inv_n, compute_dtype):
    x = x_ref[...]
    h1 = _matmul(x, w1_ref[...], compute_dtype) + b1_ref[...]
    s1, q1 = _col_sums(h1)
    x1 = _gelu_exact(_bn_apply(h1, s1, q1, g1_ref[...], be1_ref[...], inv_n, eps))

    h2 = _matmul(x1, w2_ref[...], compute_dtype) + b2_ref[...]
    if not is_out:
        s2, q2 = _col_sums(h2)
        h2 = _gelu_exact(_bn_apply(h2, s2, q2, g2_ref[...], be2_ref[...], inv_n, eps))

    if is_res:
        res = x.astype(jnp.float32) if same_fs else x1
        out = (res + h2) * _RES_SCALE
    else:
        out = h2
    out_ref[...] = out.astype(out_ref.dtype)


def _stats1_kernel(x_ref, w1_ref, b1_ref, s_ref, q_ref, *, compute_dtype):
    # Pass 1: accumulate per-feature sum / sum-of-squares of h1 = x @ W1 + b1.
    @pl.when(pl.program_id(1) == 0)
    def _init():
        s_ref[...] = jnp.zeros_like(s_ref)
        q_ref[...] = jnp.zeros_like(q_ref)

    h = _matmul(x_ref[...], w1_ref[...], compute_dtype) + b1_ref[...]
    s, q = _col_sums(h)
    s_ref[...] += s          # broadcasts over the _STATS_ROWS sublane copies
    q_ref[...] += q


def _mid_kernel(x_ref, w1_ref, b1_ref, s1_ref, q1_ref, g1_ref, be1_ref,
                w2_ref, b2_ref, *out_refs, nc1, inv_n, eps, compute_dtype,
                write_x1):
    # Pass 2 (not is_out): recompute h1, apply BN1+GELU, compute h2, write h2
    # (and x1 only if needed as residual), accumulate BN2 stats.
    if write_x1:
        h2_ref, x1_ref, s2_ref, q2_ref = out_refs
    else:
        h2_ref, s2_ref, q2_ref = out_refs
        x1_ref = None

    @pl.when(pl.program_id(1) == 0)
    def _init():
        s2_ref[...] = jnp.zeros_like(s2_ref)
        q2_ref[...] = jnp.zeros_like(q2_ref)

    h1 = _matmul(x_ref[...], w1_ref[...], compute_dtype) + b1_ref[...]
    s1 = _fold_stats(s1_ref[...], nc1)
    q1 = _fold_stats(q1_ref[...], nc1)
    x1 = _gelu_exact(_bn_apply(h1, s1, q1, g1_ref[...], be1_ref[...], inv_n, eps))
    if write_x1:
        x1_ref[...] = x1.astype(x1_ref.dtype)

    h2 = _matmul(x1, w2_ref[...], compute_dtype) + b2_ref[...]
    h2_store = h2.astype(h2_ref.dtype)
    h2_ref[...] = h2_store
    # Stats from the stored-precision values so BN2 normalization is consistent.
    s2, q2 = _col_sums(h2_store.astype(jnp.float32))
    s2_ref[...] += s2
    q2_ref[...] += q2


def _mid_out_kernel(x_ref, w1_ref, b1_ref, s1_ref, q1_ref, g1_ref, be1_ref,
                    w2_ref, b2_ref, out_ref, *, nc1, inv_n, eps, compute_dtype,
                    res_mode):
    # Pass 2 (is_out): recompute h1, BN1+GELU, final Linear, residual, scale.
    h1 = _matmul(x_ref[...], w1_ref[...], compute_dtype) + b1_ref[...]
    s1 = _fold_stats(s1_ref[...], nc1)
    q1 = _fold_stats(q1_ref[...], nc1)
    x1 = _gelu_exact(_bn_apply(h1, s1, q1, g1_ref[...], be1_ref[...], inv_n, eps))
    h2 = _matmul(x1, w2_ref[...], compute_dtype) + b2_ref[...]
    if res_mode == "input":
        out = (x_ref[...].astype(jnp.float32) + h2) * _RES_SCALE
    elif res_mode == "x1":
        out = (x1 + h2) * _RES_SCALE
    else:
        out = h2
    out_ref[...] = out.astype(out_ref.dtype)


def _final_kernel(h2_ref, s2_ref, q2_ref, g2_ref, be2_ref, *rest, nc2, inv_n,
                  eps, has_res):
    # Pass 3 (not is_out): BN2 + GELU (+ residual) / 1.414.
    if has_res:
        res_ref, out_ref = rest
    else:
        (out_ref,) = rest
    s2 = _fold_stats(s2_ref[...], nc2)
    q2 = _fold_stats(q2_ref[...], nc2)
    y = _gelu_exact(_bn_apply(h2_ref[...].astype(jnp.float32), s2, q2,
                              g2_ref[...], be2_ref[...], inv_n, eps))
    if has_res:
        y = (res_ref[...].astype(jnp.float32) + y) * _RES_SCALE
    out_ref[...] = y.astype(out_ref.dtype)


# --------------------------------------------------------------------------- #
# pallas_call stage wrappers (tiled path)
# --------------------------------------------------------------------------- #
def _inv_spec_factory(grid_rank, single_buffer):
    const = (lambda c, i: (0, 0)) if grid_rank == 2 else (lambda i: (0, 0))

    def make(shape):
        if single_buffer:
            return pl.BlockSpec(shape, const, pipeline_mode=pl.Buffered(1))
        return pl.BlockSpec(shape, const)
    return make


def _stage1_stats(x, w1t, b1, *, bt, nc, compute_dtype, single_buffer):
    B, in_fs = x.shape
    out_fs = w1t.shape[1]
    steps = (B // bt) // nc
    inv = _inv_spec_factory(2, single_buffer)
    x_spec = pl.BlockSpec((bt, in_fs), lambda c, i: (c * steps + i, 0))
    stat_spec = pl.BlockSpec((_STATS_ROWS, out_fs), lambda c, i: (c, 0))
    est = _blocks_bytes([((bt, in_fs), x.dtype),
                         ((in_fs, out_fs), w1t.dtype),
                         ((1, out_fs), jnp.float32)]
                        + [((_STATS_ROWS, out_fs), jnp.float32)] * 2) * 2
    kernel = functools.partial(_stats1_kernel, compute_dtype=compute_dtype)
    return pl.pallas_call(
        kernel, grid=(nc, steps),
        in_specs=[x_spec, inv((in_fs, out_fs)), inv((1, out_fs))],
        out_specs=[stat_spec, stat_spec],
        out_shape=[jax.ShapeDtypeStruct((nc * _STATS_ROWS, out_fs), jnp.float32)] * 2,
        compiler_params=_mosaic_params(("parallel", "arbitrary"), est),
    )(x, w1t, b1)


def _stage2_mid(x, w1t, b1, s1, q1, g1, be1, w2t, b2, *, bt, nc, inv_n, eps,
                compute_dtype, inter_dtype, write_x1, single_buffer):
    B, in_fs = x.shape
    out_fs = w1t.shape[1]
    steps = (B // bt) // nc
    inv = _inv_spec_factory(2, single_buffer)
    x_spec = pl.BlockSpec((bt, in_fs), lambda c, i: (c * steps + i, 0))
    tile_spec = pl.BlockSpec((bt, out_fs), lambda c, i: (c * steps + i, 0))
    stat_out = pl.BlockSpec((_STATS_ROWS, out_fs), lambda c, i: (c, 0))
    row = inv((1, out_fs))
    s1_spec = inv((nc * _STATS_ROWS, out_fs))

    out_specs = [tile_spec]
    out_shape = [jax.ShapeDtypeStruct((B, out_fs), inter_dtype)]
    if write_x1:
        out_specs.append(tile_spec)
        out_shape.append(jax.ShapeDtypeStruct((B, out_fs), inter_dtype))
    out_specs += [stat_out, stat_out]
    out_shape += [jax.ShapeDtypeStruct((nc * _STATS_ROWS, out_fs), jnp.float32)] * 2

    est = _blocks_bytes(
        [((bt, in_fs), x.dtype), ((in_fs, out_fs), w1t.dtype),
         ((out_fs, out_fs), w2t.dtype),
         ((nc * _STATS_ROWS, out_fs), jnp.float32)]
        + [((1, out_fs), jnp.float32)] * 5
        + [((bt, out_fs), inter_dtype)] * (2 if write_x1 else 1)
        + [((_STATS_ROWS, out_fs), jnp.float32)] * 2) * 2
    kernel = functools.partial(_mid_kernel, nc1=nc, inv_n=inv_n, eps=eps,
                               compute_dtype=compute_dtype, write_x1=write_x1)
    return pl.pallas_call(
        kernel, grid=(nc, steps),
        in_specs=[x_spec, inv((in_fs, out_fs)), row, s1_spec, s1_spec,
                  row, row, inv((out_fs, out_fs)), row],
        out_specs=out_specs,
        out_shape=out_shape,
        compiler_params=_mosaic_params(("parallel", "arbitrary"), est),
    )(x, w1t, b1, s1, q1, g1, be1, w2t, b2)


def _stage2_out(x, w1t, b1, s1, q1, g1, be1, w2t, b2, *, bt, nc1, inv_n, eps,
                compute_dtype, res_mode, out_dtype, single_buffer):
    B, in_fs = x.shape
    out_fs = w1t.shape[1]
    grid = (B // bt,)
    inv = _inv_spec_factory(1, single_buffer)
    x_spec = pl.BlockSpec((bt, in_fs), lambda i: (i, 0))
    out_spec = pl.BlockSpec((bt, out_fs), lambda i: (i, 0))
    row = inv((1, out_fs))
    s1_spec = inv((nc1 * _STATS_ROWS, out_fs))
    est = _blocks_bytes(
        [((bt, in_fs), x.dtype), ((in_fs, out_fs), w1t.dtype),
         ((out_fs, out_fs), w2t.dtype),
         ((nc1 * _STATS_ROWS, out_fs), jnp.float32),
         ((bt, out_fs), out_dtype)]
        + [((1, out_fs), jnp.float32)] * 5) * 2
    kernel = functools.partial(_mid_out_kernel, nc1=nc1, inv_n=inv_n, eps=eps,
                               compute_dtype=compute_dtype, res_mode=res_mode)
    return pl.pallas_call(
        kernel, grid=grid,
        in_specs=[x_spec, inv((in_fs, out_fs)), row, s1_spec, s1_spec,
                  row, row, inv((out_fs, out_fs)), row],
        out_specs=out_spec,
        out_shape=jax.ShapeDtypeStruct((B, out_fs), out_dtype),
        compiler_params=_mosaic_params(("parallel",), est),
    )(x, w1t, b1, s1, q1, g1, be1, w2t, b2)


def _stage3_final(h2, s2, q2, g2, be2, res, *, bt, nc2, inv_n, eps, out_dtype,
                  single_buffer):
    B, out_fs = h2.shape
    grid = (B // bt,)
    inv = _inv_spec_factory(1, single_buffer)
    tile = pl.BlockSpec((bt, out_fs), lambda i: (i, 0))
    row = inv((1, out_fs))
    s2_spec = inv((nc2 * _STATS_ROWS, out_fs))
    has_res = res is not None
    in_specs = [tile, s2_spec, s2_spec, row, row]
    operands = [h2, s2, q2, g2, be2]
    if has_res:
        in_specs.append(pl.BlockSpec((bt, res.shape[1]), lambda i: (i, 0)))
        operands.append(res)
    est = _blocks_bytes(
        [((bt, out_fs), h2.dtype), ((nc2 * _STATS_ROWS, out_fs), jnp.float32),
         ((bt, out_fs), out_dtype)]
        + ([((bt, out_fs), res.dtype)] if has_res else [])
        + [((1, out_fs), jnp.float32)] * 3) * 2
    kernel = functools.partial(_final_kernel, nc2=nc2, inv_n=inv_n, eps=eps,
                               has_res=has_res)
    return pl.pallas_call(
        kernel, grid=grid, in_specs=in_specs, out_specs=tile,
        out_shape=jax.ShapeDtypeStruct((B, out_fs), out_dtype),
        compiler_params=_mosaic_params(("parallel",), est),
    )(*operands)


# --------------------------------------------------------------------------- #
# Forward paths
# --------------------------------------------------------------------------- #
def _fused_forward(x, w1t, b1, g1, be1, w2t, b2, g2, be2, *, is_res, is_out,
                   same_fs, eps, compute_dtype):
    B, in_fs = x.shape
    out_fs = w1t.shape[1]
    inv_n = 1.0 / B
    kernel = functools.partial(_fused_kernel, is_res=is_res, same_fs=same_fs,
                               is_out=is_out, eps=eps, inv_n=inv_n,
                               compute_dtype=compute_dtype)
    vmem = pl.BlockSpec(memory_space=pltpu.MemorySpace.VMEM)
    est = _fused_live_bytes(B, in_fs, out_fs, compute_dtype)
    return pl.pallas_call(
        kernel,
        out_shape=jax.ShapeDtypeStruct((B, out_fs), x.dtype),
        in_specs=[vmem] * 9,
        out_specs=vmem,
        compiler_params=_mosaic_params(None, est),
    )(x, w1t, b1, g1, be1, w2t, b2, g2, be2)


def _tiled_forward(x, w1t, b1, g1, be1, w2t, b2, g2, be2, *, is_res, is_out,
                   same_fs, eps, compute_dtype, inter_dtype, bt, single_buffer):
    B, in_fs = x.shape
    out_fs = w1t.shape[1]
    inv_n = 1.0 / B
    n_tiles = B // bt
    # Split the stats-accumulating stages into 2 independent chunks so v7x's
    # two TensorCores each own one partial accumulator (harmless on 1-TC chips).
    nc = 2 if (n_tiles >= 2 and n_tiles % 2 == 0) else 1

    # Pass 1: BN1 batch statistics only (no h1 HBM round-trip).
    s1, q1 = _stage1_stats(x, w1t, b1, bt=bt, nc=nc,
                           compute_dtype=compute_dtype,
                           single_buffer=single_buffer)

    if is_out:
        res_mode = "input" if (is_res and same_fs) else ("x1" if is_res else "none")
        return _stage2_out(x, w1t, b1, s1, q1, g1, be1, w2t, b2, bt=bt, nc1=nc,
                           inv_n=inv_n, eps=eps, compute_dtype=compute_dtype,
                           res_mode=res_mode, out_dtype=x.dtype,
                           single_buffer=single_buffer)

    # Pass 2: recompute h1, BN1+GELU, h2 = x1 @ W2 + b2, BN2 stats.
    write_x1 = is_res and not same_fs
    outs = _stage2_mid(x, w1t, b1, s1, q1, g1, be1, w2t, b2, bt=bt, nc=nc,
                       inv_n=inv_n, eps=eps, compute_dtype=compute_dtype,
                       inter_dtype=inter_dtype, write_x1=write_x1,
                       single_buffer=single_buffer)
    if write_x1:
        h2, x1, s2, q2 = outs
    else:
        h2, s2, q2 = outs
        x1 = None

    # Pass 3: BN2 + GELU (+ residual) / 1.414.
    res = (x if same_fs else x1) if is_res else None
    return _stage3_final(h2, s2, q2, g2, be2, res, bt=bt, nc2=nc, inv_n=inv_n,
                         eps=eps, out_dtype=x.dtype, single_buffer=single_buffer)


def residual_mlp_block(x, params, *, is_res, is_out, eps=1e-5, use_bf16=True,
                       mode="auto", batch_tile=None):
    """Forward pass of ResidualMLPBlock. x: (B, in_fs) float32."""
    B, in_fs = x.shape
    out_fs = params["w1"].shape[0]
    same_fs = in_fs == out_fs
    compute_dtype = jnp.bfloat16 if use_bf16 else jnp.float32
    inter_dtype = jnp.bfloat16 if use_bf16 else jnp.float32

    # One-time wrapper-side prep: transpose to (in, out) so kernels run the
    # canonical (M,K)x(K,N) contraction, and cast weights to the MXU input
    # dtype once (not per grid step). Biases / BN params stay f32 rows.
    w1t = params["w1"].T.astype(compute_dtype)
    w2t = params["w2"].T.astype(compute_dtype)
    b1 = params["b1"].reshape(1, out_fs).astype(jnp.float32)
    b2 = params["b2"].reshape(1, out_fs).astype(jnp.float32)
    g1 = params["gamma1"].reshape(1, out_fs).astype(jnp.float32)
    be1 = params["beta1"].reshape(1, out_fs).astype(jnp.float32)
    g2 = params.get("gamma2", None)
    g2 = jnp.ones((1, out_fs), jnp.float32) if g2 is None else \
        g2.reshape(1, out_fs).astype(jnp.float32)
    be2 = params.get("beta2", None)
    be2 = jnp.zeros((1, out_fs), jnp.float32) if be2 is None else \
        be2.reshape(1, out_fs).astype(jnp.float32)

    vmem_cap = _vmem_capacity_bytes()
    if mode == "auto":
        mode = ("fused"
                if _fused_live_bytes(B, in_fs, out_fs, compute_dtype)
                <= int(0.25 * vmem_cap) else "tiled")

    if mode == "fused":
        return _fused_forward(x, w1t, b1, g1, be1, w2t, b2, g2, be2,
                              is_res=is_res, is_out=is_out, same_fs=same_fs,
                              eps=float(eps), compute_dtype=compute_dtype)

    bt = batch_tile if batch_tile is not None else _pick_batch_tile(
        B, in_fs, out_fs, compute_dtype, inter_dtype, vmem_cap)
    if bt != B and (B % bt != 0 or bt % 8 != 0):
        raise ValueError(f"batch_tile={bt} must divide B={B} and be a multiple of 8")
    single_buffer = _single_buffer_supported()
    return _tiled_forward(x, w1t, b1, g1, be1, w2t, b2, g2, be2,
                          is_res=is_res, is_out=is_out, same_fs=same_fs,
                          eps=float(eps), compute_dtype=compute_dtype,
                          inter_dtype=inter_dtype, bt=bt,
                          single_buffer=single_buffer)


# --------------------------------------------------------------------------- #
# Reference + test harness
# --------------------------------------------------------------------------- #
def init_params(key, in_fs, out_fs):
    """Synthetic init mimicking nn.Linear / nn.BatchNorm1d parameter shapes."""
    k1, k2, k3, k4 = jax.random.split(key, 4)
    lim1 = 1.0 / (in_fs ** 0.5)
    lim2 = 1.0 / (out_fs ** 0.5)
    return {
        "w1": jax.random.uniform(k1, (out_fs, in_fs), jnp.float32, -lim1, lim1),
        "b1": jax.random.uniform(k2, (out_fs,), jnp.float32, -lim1, lim1),
        "w2": jax.random.uniform(k3, (out_fs, out_fs), jnp.float32, -lim2, lim2),
        "b2": jax.random.uniform(k4, (out_fs,), jnp.float32, -lim2, lim2),
        "gamma1": jnp.ones((out_fs,), jnp.float32),
        "beta1": jnp.zeros((out_fs,), jnp.float32),
        "gamma2": jnp.ones((out_fs,), jnp.float32),
        "beta2": jnp.zeros((out_fs,), jnp.float32),
    }


def reference_forward(x, params, *, is_res, is_out, eps=1e-5):
    """Pure-JAX reference mirroring the PyTorch forward (training-mode BN)."""
    hp = jax.lax.Precision.HIGHEST

    def bn(h, g, b):
        m = jnp.mean(h, axis=0, keepdims=True)
        v = jnp.mean((h - m) ** 2, axis=0, keepdims=True)
        return (h - m) / jnp.sqrt(v + eps) * g + b

    def gelu(h):
        return 0.5 * h * (1.0 + lax.erf(h * _SQRT_HALF))

    x1 = gelu(bn(jnp.dot(x, params["w1"].T, precision=hp) + params["b1"],
                 params["gamma1"], params["beta1"]))
    x2 = jnp.dot(x1, params["w2"].T, precision=hp) + params["b2"]
    if not is_out:
        x2 = gelu(bn(x2, params["gamma2"], params["beta2"]))
    if is_res:
        res = x if x.shape[-1] == x2.shape[-1] else x1
        return (res + x2) / 1.414
    return x2


if __name__ == "__main__":
    key = jax.random.PRNGKey(0)

    # (B, in_fs, out_fs, is_res, is_out, modes) — 128-aligned, lane-dense shapes.
    configs = [
        (256, 128, 128, True,  False, ("fused", "tiled")),
        (256, 128, 256, True,  False, ("tiled",)),          # x1-residual write path
        (256, 128, 256, True,  True,  ("fused", "tiled")),
        (256, 128, 128, True,  True,  ("tiled",)),
        (256, 128, 256, False, True,  ("tiled",)),
        (256, 128, 128, False, False, ("tiled",)),
    ]
    for (B, in_fs, out_fs, is_res, is_out, modes) in configs:
        key, kx, kp = jax.random.split(key, 3)
        x = jax.random.normal(kx, (B, in_fs), jnp.float32)
        params = init_params(kp, in_fs, out_fs)
        ref = reference_forward(x, params, is_res=is_res, is_out=is_out)
        for mode in modes:
            use_bf16 = mode == "tiled"   # exercise both the f32 and bf16 MXU paths
            out = residual_mlp_block(x, params, is_res=is_res, is_out=is_out,
                                     mode=mode, use_bf16=use_bf16, batch_tile=64)
            out = jax.block_until_ready(out)
            assert out.shape == ref.shape, (out.shape, ref.shape)
            err = float(jnp.max(jnp.abs(out - ref)))
            # bf16 MXU operands / bf16 intermediates need a loose tolerance.
            assert jnp.allclose(out, ref, atol=5e-2, rtol=5e-2), (
                f"mismatch mode={mode} is_res={is_res} is_out={is_out} "
                f"max_abs_err={err:.3e}")
    print("KERNEL_OK")
</pallas_src>

<mosaic_0001>
module attributes {stable_mosaic.version = 11 : i64} {
  func.func @_fused_kernel(%arg0: memref<256x128xf32, #tpu.memory_space<vmem>>, %arg1: memref<128x128xf32, #tpu.memory_space<vmem>>, %arg2: memref<1x128xf32, #tpu.memory_space<vmem>>, %arg3: memref<1x128xf32, #tpu.memory_space<vmem>>, %arg4: memref<1x128xf32, #tpu.memory_space<vmem>>, %arg5: memref<128x128xf32, #tpu.memory_space<vmem>>, %arg6: memref<1x128xf32, #tpu.memory_space<vmem>>, %arg7: memref<1x128xf32, #tpu.memory_space<vmem>>, %arg8: memref<1x128xf32, #tpu.memory_space<vmem>>, %arg9: memref<256x128xf32, #tpu.memory_space<vmem>>) attributes {dimension_semantics = [], scalar_prefetch = 0 : i64, scratch_operands = 0 : i64, tpu.core_type = #tpu.core_type<tc>} {
    %c0 = arith.constant 0 : index
    %c0_0 = arith.constant 0 : index
    %0 = vector.load %arg0[%c0, %c0_0] : memref<256x128xf32, #tpu.memory_space<vmem>>, vector<256x128xf32>
    %c0_1 = arith.constant 0 : index
    %c0_2 = arith.constant 0 : index
    %1 = vector.load %arg1[%c0_1, %c0_2] : memref<128x128xf32, #tpu.memory_space<vmem>>, vector<128x128xf32>
    %cst = arith.constant dense<0.000000e+00> : vector<256x128xf32>
    %2 = tpu.matmul %0, %1, %cst {dimension_numbers = #tpu.dot_dimension_numbers<[1], [0], [0], [1], [0, 0, 1, 1], [], []>} : vector<256x128xf32>, vector<128x128xf32>, vector<256x128xf32> -> vector<256x128xf32>
    %c0_3 = arith.constant 0 : index
    %c0_4 = arith.constant 0 : index
    %3 = vector.load %arg2[%c0_3, %c0_4] : memref<1x128xf32, #tpu.memory_space<vmem>>, vector<1x128xf32>
    %4 = vector.broadcast %3 : vector<1x128xf32> to vector<256x128xf32>
    %5 = arith.addf %2, %4 : vector<256x128xf32>
    %cst_5 = arith.constant 1.000000e+00 : f32
    %6 = vector.broadcast %cst_5 : f32 to vector<1x256xf32>
    %cst_6 = arith.constant dense<0.000000e+00> : vector<1x128xf32>
    %7 = tpu.matmul %6, %5, %cst_6 {dimension_numbers = #tpu.dot_dimension_numbers<[1], [0], [0], [1], [0, 0, 1, 1], [], []>} : vector<1x256xf32>, vector<256x128xf32>, vector<1x128xf32> -> vector<1x128xf32>
    %8 = arith.mulf %5, %5 : vector<256x128xf32>
    %cst_7 = arith.constant dense<0.000000e+00> : vector<1x128xf32>
    %9 = tpu.matmul %6, %8, %cst_7 {dimension_numbers = #tpu.dot_dimension_numbers<[1], [0], [0], [1], [0, 0, 1, 1], [], []>} : vector<1x256xf32>, vector<256x128xf32>, vector<1x128xf32> -> vector<1x128xf32>
    %c0_8 = arith.constant 0 : index
    %c0_9 = arith.constant 0 : index
    %10 = vector.load %arg3[%c0_8, %c0_9] : memref<1x128xf32, #tpu.memory_space<vmem>>, vector<1x128xf32>
    %c0_10 = arith.constant 0 : index
    %c0_11 = arith.constant 0 : index
    %11 = vector.load %arg4[%c0_10, %c0_11] : memref<1x128xf32, #tpu.memory_space<vmem>>, vector<1x128xf32>
    %cst_12 = arith.constant 3.906250e-03 : f32
    %12 = vector.broadcast %cst_12 : f32 to vector<1x128xf32>
    %13 = arith.mulf %7, %12 : vector<1x128xf32>
    %cst_13 = arith.constant 3.906250e-03 : f32
    %14 = vector.broadcast %cst_13 : f32 to vector<1x128xf32>
    %15 = arith.mulf %9, %14 : vector<1x128xf32>
    %16 = arith.mulf %13, %13 : vector<1x128xf32>
    %17 = arith.subf %15, %16 : vector<1x128xf32>
    %cst_14 = arith.constant 0.000000e+00 : f32
    %18 = vector.broadcast %cst_14 : f32 to vector<1x128xf32>
    %19 = arith.maximumf %17, %18 : vector<1x128xf32>
    %20 = vector.broadcast %13 : vector<1x128xf32> to vector<256x128xf32>
    %21 = arith.subf %5, %20 : vector<256x128xf32>
    %cst_15 = arith.constant 9.99999974E-6 : f32
    %22 = vector.broadcast %cst_15 : f32 to vector<1x128xf32>
    %23 = arith.addf %19, %22 : vector<1x128xf32>
    %24 = math.rsqrt %23 : vector<1x128xf32>
    %25 = vector.broadcast %24 : vector<1x128xf32> to vector<256x128xf32>
    %26 = arith.mulf %21, %25 : vector<256x128xf32>
    %27 = vector.broadcast %10 : vector<1x128xf32> to vector<256x128xf32>
    %28 = arith.mulf %26, %27 : vector<256x128xf32>
    %29 = vector.broadcast %11 : vector<1x128xf32> to vector<256x128xf32>
    %30 = arith.addf %28, %29 : vector<256x128xf32>
    %cst_16 = arith.constant 5.000000e-01 : f32
    %31 = vector.broadcast %cst_16 : f32 to vector<256x128xf32>
    %32 = arith.mulf %31, %30 : vector<256x128xf32>
    %cst_17 = arith.constant 0.707106769 : f32
    %33 = vector.broadcast %cst_17 : f32 to vector<256x128xf32>
    %34 = arith.mulf %30, %33 : vector<256x128xf32>
    %35 = math.erf %34 : vector<256x128xf32>
    %cst_18 = arith.constant 1.000000e+00 : f32
    %36 = vector.broadcast %cst_18 : f32 to vector<256x128xf32>
    %37 = arith.addf %36, %35 : vector<256x128xf32>
    %38 = arith.mulf %32, %37 : vector<256x128xf32>
    %c0_19 = arith.constant 0 : index
    %c0_20 = arith.constant 0 : index
    %39 = vector.load %arg5[%c0_19, %c0_20] : memref<128x128xf32, #tpu.memory_space<vmem>>, vector<128x128xf32>
    %cst_21 = arith.constant dense<0.000000e+00> : vector<256x128xf32>
    %40 = tpu.matmul %38, %39, %cst_21 {dimension_numbers = #tpu.dot_dimension_numbers<[1], [0], [0], [1], [0, 0, 1, 1], [], []>} : vector<256x128xf32>, vector<128x128xf32>, vector<256x128xf32> -> vector<256x128xf32>
    %c0_22 = arith.constant 0 : index
    %c0_23 = arith.constant 0 : index
    %41 = vector.load %arg6[%c0_22, %c0_23] : memref<1x128xf32, #tpu.memory_space<vmem>>, vector<1x128xf32>
    %42 = vector.broadcast %41 : vector<1x128xf32> to vector<256x128xf32>
    %43 = arith.addf %40, %42 : vector<256x128xf32>
    %cst_24 = arith.constant 1.000000e+00 : f32
    %44 = vector.broadcast %cst_24 : f32 to vector<1x256xf32>
    %cst_25 = arith.constant dense<0.000000e+00> : vector<1x128xf32>
    %45 = tpu.matmul %44, %43, %cst_25 {dimension_numbers = #tpu.dot_dimension_numbers<[1], [0], [0], [1], [0, 0, 1, 1], [], []>} : vector<1x256xf32>, vector<256x128xf32>, vector<1x128xf32> -> vector<1x128xf32>
    %46 = arith.mulf %43, %43 : vector<256x128xf32>
    %cst_26 = arith.constant dense<0.000000e+00> : vector<1x128xf32>
    %47 = tpu.matmul %44, %46, %cst_26 {dimension_numbers = #tpu.dot_dimension_numbers<[1], [0], [0], [1], [0, 0, 1, 1], [], []>} : vector<1x256xf32>, vector<256x128xf32>, vector<1x128xf32> -> vector<1x128xf32>
    %c0_27 = arith.constant 0 : index
    %c0_28 = arith.constant 0 : index
    %48 = vector.load %arg7[%c0_27, %c0_28] : memref<1x128xf32, #tpu.memory_space<vmem>>, vector<1x128xf32>
    %c0_29 = arith.constant 0 : index
    %c0_30 = arith.constant 0 : index
    %49 = vector.load %arg8[%c0_29, %c0_30] : memref<1x128xf32, #tpu.memory_space<vmem>>, vector<1x128xf32>
    %cst_31 = arith.constant 3.906250e-03 : f32
    %50 = vector.broadcast %cst_31 : f32 to vector<1x128xf32>
    %51 = arith.mulf %45, %50 : vector<1x128xf32>
    %cst_32 = arith.constant 3.906250e-03 : f32
    %52 = vector.broadcast %cst_32 : f32 to vector<1x128xf32>
    %53 = arith.mulf %47, %52 : vector<1x128xf32>
    %54 = arith.mulf %51, %51 : vector<1x128xf32>
    %55 = arith.subf %53, %54 : vector<1x128xf32>
    %cst_33 = arith.constant 0.000000e+00 : f32
    %56 = vector.broadcast %cst_33 : f32 to vector<1x128xf32>
    %57 = arith.maximumf %55, %56 : vector<1x128xf32>
    %58 = vector.broadcast %51 : vector<1x128xf32> to vector<256x128xf32>
    %59 = arith.subf %43, %58 : vector<256x128xf32>
    %cst_34 = arith.constant 9.99999974E-6 : f32
    %60 = vector.broadcast %cst_34 : f32 to vector<1x128xf32>
    %61 = arith.addf %57, %60 : vector<1x128xf32>
    %62 = math.rsqrt %61 : vector<1x128xf32>
    %63 = vector.broadcast %62 : vector<1x128xf32> to vector<256x128xf32>
    %64 = arith.mulf %59, %63 : vector<256x128xf32>
    %65 = vector.broadcast %48 : vector<1x128xf32> to vector<256x128xf32>
    %66 = arith.mulf %64, %65 : vector<256x128xf32>
    %67 = vector.broadcast %49 : vector<1x128xf32> to vector<256x128xf32>
    %68 = arith.addf %66, %67 : vector<256x128xf32>
    %cst_35 = arith.constant 5.000000e-01 : f32
    %69 = vector.broadcast %cst_35 : f32 to vector<256x128xf32>
    %70 = arith.mulf %69, %68 : vector<256x128xf32>
    %cst_36 = arith.constant 0.707106769 : f32
    %71 = vector.broadcast %cst_36 : f32 to vector<256x128xf32>
    %72 = arith.mulf %68, %71 : vector<256x128xf32>
    %73 = math.erf %72 : vector<256x128xf32>
    %cst_37 = arith.constant 1.000000e+00 : f32
    %74 = vector.broadcast %cst_37 : f32 to vector<256x128xf32>
    %75 = arith.addf %74, %73 : vector<256x128xf32>
    %76 = arith.mulf %70, %75 : vector<256x128xf32>
    %77 = arith.addf %0, %76 : vector<256x128xf32>
    %cst_38 = arith.constant 0.70721358 : f32
    %78 = vector.broadcast %cst_38 : f32 to vector<256x128xf32>
    %79 = arith.mulf %77, %78 : vector<256x128xf32>
    %c0_39 = arith.constant 0 : index
    %c0_40 = arith.constant 0 : index
    %80 = vector.load %arg9[%c0_39, %c0_40] : memref<256x128xf32, #tpu.memory_space<vmem>>, vector<256x128xf32>
    tpu.vector_store %arg9[%c0_39, %c0_40], %79 {strides = array<i32>} : memref<256x128xf32, #tpu.memory_space<vmem>>, vector<256x128xf32>,
    return
  }
}

</mosaic_0001>

<bundles_post_ra>
// kernel: tpu_custom_call.1
= control target key start
LH: loop header
LB: loop body
LE: loop exit
PB: predicated region body
PF: predicated region fallthrough
CT: control target
= control target key end

     0   :  { %14 = vsyncpa [#allocation3], 0  ;;  %s3577_s0 = inlined_call_operand.hbm [shape: f32[256,128], index: 0, kind: input, shape index: {}]   ;;  %s3578_s1 = inlined_call_operand.hbm [shape: f32[128,128], index: 1, kind: input, shape index: {}]   ;;  %s3579_s2 = inlined_call_operand.vmem [shape: f32[1,128], index: 2, kind: input, shape index: {}]   ;;  %s3580_s3 = inlined_call_operand.vmem [shape: f32[1,128], index: 3, kind: input, shape index: {}]   ;;  %s3581_s4 = inlined_call_operand.vmem [shape: f32[1,128], index: 4, kind: input, shape index: {}]   ;;  %s3582_s5 = inlined_call_operand.hbm [shape: f32[128,128], index: 5, kind: input, shape index: {}]   ;;  %s3583_s6 = inlined_call_operand.vmem [shape: f32[1,128], index: 6, kind: input, shape index: {}]   ;;  %s3584_s7 = inlined_call_operand.vmem [shape: f32[1,128], index: 7, kind: input, shape index: {}]   ;;  %s3585_s8 = inlined_call_operand.vmem [shape: f32[1,128], index: 8, kind: input, shape index: {}]   ;;  %s3586_s9 = inlined_call_operand.hbm [shape: f32[256,128], index: 9, kind: output, shape index: {}]  }
   0x1   :  { %15 = vsyncpa [#allocation6], 0 }
   0x2   :  { %16 = vsyncpa [#allocation4], 0  ;;  %s2353_s30 = smov [#allocation5]   ;;  %s2354_s11 = smov [#allocation2]  }
   0x3   :  { %s34_s10 = sshll.u32 %s2353_s30, 4  ;;  %s22_s12 = sshll.u32 %s2354_s11, 4  ;;  %s35_s10 = int_to_ptr.vmem [resolvable:$true] %s34_s10  ;;  %s23_s12 = int_to_ptr.vmem [resolvable:$true] %s22_s12 }
   0x4   :  { %s2275_s13 = scalar_lea.vmem %s35_s10, 2048  ;;  %p2280_p1 = scmp.lt.s32.totalorder %s35_s10, %s35_s10 }
   0x5   :  { %p2276_p0 = scmp.ne.s32.totalorder %s35_s10, %s2275_s13  ;;  %p2281_p2 = scmp.lt.s32.totalorder %s2275_s13, %s2275_s13 }
   0x7   :  { %p2282_p3 = por %p2281_p2, %p2280_p1 }
   0x9   :  { %p2283_p4 = pnand %p2282_p3, %p2276_p0 }
   0xb   :  { %2286 = shalt.err (!%p2283_p4)
}
   0xc   :  { %s2355_s14 = smov 128   ;;  %s2356_s15 = smov 8  }
   0xd   :  { %40 = dma.hbm_to_vmem [thread:$0]  %s3578_s1, 2048, %s35_s10, [#allocation6], %s2355_s14, %s2355_s14, %s2356_s15  }
   0xe   :  { %s2295_s18 = scalar_lea.vmem %s23_s12, 4096  ;;  %p2300_p6 = scmp.lt.s32.totalorder %s23_s12, %s23_s12 }
   0xf   :  { %p2296_p5 = scmp.ne.s32.totalorder %s23_s12, %s2295_s18  ;;  %p2301_p7 = scmp.lt.s32.totalorder %s2295_s18, %s2295_s18 }
  0x11   :  { %p2302_p8 = por %p2301_p7, %p2300_p6 }
  0x13   :  { %p2303_p9 = pnand %p2302_p8, %p2296_p5 }
  0x15   :  { %2306 = shalt.err (!%p2303_p9)
}
  0x16   :  { %28 = dma.hbm_to_vmem [thread:$0]  %s3577_s0, 4096, %s23_s12, [#allocation3], %s2355_s14, %s2355_s14, %s2356_s15  }
  0x17   :  { %s2357_s21 = smov [#allocation7]  }
  0x18   :  { %s52_s22 = sshll.u32 %s2357_s21, 4  ;;  %s53_s22 = int_to_ptr.vmem [resolvable:$true] %s52_s22 }
  0x19   :  { %s2315_s23 = scalar_lea.vmem %s53_s22, 2048  ;;  %p2320_p11 = scmp.lt.s32.totalorder %s53_s22, %s53_s22 }
  0x1a   :  { %p2316_p10 = scmp.ne.s32.totalorder %s53_s22, %s2315_s23  ;;  %p2321_p12 = scmp.lt.s32.totalorder %s2315_s23, %s2315_s23 }
  0x1c   :  { %p2322_p13 = por %p2321_p12, %p2320_p11 }
  0x1e   :  { %p2323_p0 = pnand %p2322_p13, %p2316_p10 }
  0x20   :  { %2326 = shalt.err (!%p2323_p0)
}
  0x21   :  { %58 = dma.hbm_to_vmem [thread:$0]  %s3582_s5, 2048, %s53_s22, [#allocation6], %s2355_s14, %s2355_s14, %s2356_s15  }
  0x22   :  { %2347 = dma.done.wait [#allocation3], 4096  }
  0x23   :  { %2348 = vsyncadd [#allocation3], 4294963200 }
  0x24   :  { %2349 = dma.done.wait [#allocation6], 4096  }
  0x25   :  { %2350 = vsyncadd [#allocation6], 4294963200  ;;  %v121_v0 = vld [vmem:[#allocation5 + $0x78] sm:$0xff]  ;;  %v120_v1 = vld [vmem:[#allocation5 + $0x70] sm:$0xff]  ;;  %v3587_v48 = vmov 1.0  }
  0x26   :  { %1936 = vmatprep.subr.mxu0 %v121_v0  ;;  %v119_v2 = vld [vmem:[#allocation5 + $0x68] sm:$0xff]  ;;  %v118_v3 = vld [vmem:[#allocation5 + $0x60] sm:$0xff]  ;;  %v117_v5 = vld [vmem:[#allocation5 + $0x58] sm:$0xff]  ;;  %418 = vmatprep.mubr.f32.mxu1 %v3587_v48 }
  0x27   :  { %1937 = vmatpush3.msra.mxu0 %v121_v0  ;;  %v74_v4 = vld [vmem:[#allocation2] sm:$0xff]  ;;  %v116_v6 = vld [vmem:[#allocation5 + $0x50] sm:$0xff]  ;;  %v115_v7 = vld [vmem:[#allocation5 + $0x48] sm:$0xff] }
  0x28   :  { %1938 = vmatprep.subr.mxu0 %v120_v1  ;;  %1968 = vmatprep.mubr.f32.mxu0 %v74_v4  ;;  %v114_v8 = vld [vmem:[#allocation5 + $0x40] sm:$0xff]  ;;  %v113_v9 = vld [vmem:[#allocation5 + $0x38] sm:$0xff]  ;;  %v112_v10 = vld [vmem:[#allocation5 + $0x30] sm:$0xff] }
  0x29   :  { %1939 = vmatpush3.msra.mxu0 %v120_v1  ;;  %v111_v11 = vld [vmem:[#allocation5 + $0x28] sm:$0xff]  ;;  %v110_v12 = vld [vmem:[#allocation5 + $0x20] sm:$0xff]  ;;  %v109_v13 = vld [vmem:[#allocation5 + $0x18] sm:$0xff] }
  0x2a   :  { %1940 = vmatprep.subr.mxu0 %v119_v2  ;;  %v108_v14 = vld [vmem:[#allocation5 + $0x10] sm:$0xff]  ;;  %v107_v15 = vld [vmem:[#allocation5 + $0x8] sm:$0xff]  ;;  %v106_v16 = vld [vmem:[#allocation5] sm:$0xff] }
  0x2b   :  { %1941 = vmatpush3.msra.mxu0 %v119_v2  ;;  %v75_v17 = vld [vmem:[#allocation2 + $0x8] sm:$0xff]  ;;  %v76_v18 = vld [vmem:[#allocation2 + $0x10] sm:$0xff]  ;;  %v77_v19 = vld [vmem:[#allocation2 + $0x18] sm:$0xff] }
  0x2c   :  { %1942 = vmatprep.subr.mxu0 %v118_v3  ;;  %v78_v20 = vld [vmem:[#allocation2 + $0x20] sm:$0xff]  ;;  %v79_v21 = vld [vmem:[#allocation2 + $0x28] sm:$0xff]  ;;  %v80_v22 = vld [vmem:[#allocation2 + $0x30] sm:$0xff] }
  0x2d   :  { %1943 = vmatpush3.msra.mxu0 %v118_v3  ;;  %v81_v23 = vld [vmem:[#allocation2 + $0x38] sm:$0xff]  ;;  %v82_v24 = vld [vmem:[#allocation2 + $0x40] sm:$0xff]  ;;  %v83_v25 = vld [vmem:[#allocation2 + $0x48] sm:$0xff] }
  0x2e   :  { %1944 = vmatprep.subr.mxu0 %v117_v5  ;;  %v84_v26 = vld [vmem:[#allocation2 + $0x50] sm:$0xff]  ;;  %v85_v27 = vld [vmem:[#allocation2 + $0x58] sm:$0xff]  ;;  %v86_v28 = vld [vmem:[#allocation2 + $0x60] sm:$0xff] }
  0x2f   :  { %1945 = vmatpush3.msra.mxu0 %v117_v5  ;;  %v87_v29 = vld [vmem:[#allocation2 + $0x68] sm:$0xff]  ;;  %v88_v30 = vld [vmem:[#allocation2 + $0x70] sm:$0xff]  ;;  %v89_v31 = vld [vmem:[#allocation2 + $0x78] sm:$0xff] }
  0x30   :  { %1946 = vmatprep.subr.mxu0 %v116_v6  ;;  %v90_v32 = vld [vmem:[#allocation2 + $0x80] sm:$0xff]  ;;  %v91_v33 = vld [vmem:[#allocation2 + $0x88] sm:$0xff]  ;;  %v92_v34 = vld [vmem:[#allocation2 + $0x90] sm:$0xff] }
  0x31   :  { %1947 = vmatpush3.msra.mxu0 %v116_v6  ;;  %v93_v35 = vld [vmem:[#allocation2 + $0x98] sm:$0xff]  ;;  %v94_v36 = vld [vmem:[#allocation2 + $0xa0] sm:$0xff]  ;;  %v95_v37 = vld [vmem:[#allocation2 + $0xa8] sm:$0xff] }
  0x32   :  { %1948 = vmatprep.subr.mxu0 %v115_v7  ;;  %v96_v38 = vld [vmem:[#allocation2 + $0xb0] sm:$0xff]  ;;  %v97_v39 = vld [vmem:[#allocation2 + $0xb8] sm:$0xff]  ;;  %v98_v40 = vld [vmem:[#allocation2 + $0xc0] sm:$0xff] }
  0x33   :  { %1949 = vmatpush3.msra.mxu0 %v115_v7  ;;  %v99_v41 = vld [vmem:[#allocation2 + $0xc8] sm:$0xff]  ;;  %v100_v42 = vld [vmem:[#allocation2 + $0xd0] sm:$0xff]  ;;  %v101_v43 = vld [vmem:[#allocation2 + $0xd8] sm:$0xff] }
  0x34   :  { %1950 = vmatprep.subr.mxu0 %v114_v8  ;;  %v102_v44 = vld [vmem:[#allocation2 + $0xe0] sm:$0xff]  ;;  %v103_v45 = vld [vmem:[#allocation2 + $0xe8] sm:$0xff]  ;;  %v104_v46 = vld [vmem:[#allocation2 + $0xf0] sm:$0xff] }
  0x35   :  { %1951 = vmatpush3.msra.mxu0 %v114_v8  ;;  %v105_v47 = vld [vmem:[#allocation2 + $0xf8] sm:$0xff] }
  0x36   :  { %1952 = vmatprep.subr.mxu0 %v113_v9 }
  0x37   :  { %1953 = vmatpush3.msra.mxu0 %v113_v9 }
  0x38   :  { %1954 = vmatprep.subr.mxu0 %v112_v10 }
  0x39   :  { %1955 = vmatpush3.msra.mxu0 %v112_v10 }
  0x3a   :  { %1956 = vmatprep.subr.mxu0 %v111_v11 }
  0x3b   :  { %1957 = vmatpush3.msra.mxu0 %v111_v11 }
  0x3c   :  { %1958 = vmatprep.subr.mxu0 %v110_v12 }
  0x3d   :  { %1959 = vmatpush3.msra.mxu0 %v110_v12 }
  0x3e   :  { %1960 = vmatprep.subr.mxu0 %v109_v13 }
  0x3f   :  { %1961 = vmatpush3.msra.mxu0 %v109_v13 }
  0x40   :  { %1962 = vmatprep.subr.mxu0 %v108_v14 }
  0x41   :  { %1963 = vmatpush3.msra.mxu0 %v108_v14 }
  0x42   :  { %1964 = vmatprep.subr.mxu0 %v107_v15 }
  0x43   :  { %1965 = vmatpush3.msra.mxu0 %v107_v15  ;;  %v2450_v15 = vld [vmem:[%s3579_s2] ss:$0 sm:$0xff] }
  0x44   :  { %1966 = vmatprep.subr.mxu0 %v106_v16 }
  0x45   :  { %1967 = vmatpush3.msra.mxu0 %v106_v16 }
  0x46   :  { %1969 = vmatmul.mubr.f32.vlgmr.msra.gmra.mxu0 %v75_v17 }
  0x47   :  { %1971 = vmatprep.mubr.f32.mxu0 %v76_v18 }
  0x4a   :  { %1972 = vmatmul.mubr.f32.gmra.mxu0 %v77_v19 }
  0x4b   :  { %1974 = vmatprep.mubr.f32.mxu0 %v78_v20 }
  0x4e   :  { %1975 = vmatmul.mubr.f32.gmra.mxu0 %v79_v21 }
  0x4f   :  { %1977 = vmatprep.mubr.f32.mxu0 %v80_v22 }
  0x52   :  { %1978 = vmatmul.mubr.f32.gmra.mxu0 %v81_v23 }
  0x53   :  { %1980 = vmatprep.mubr.f32.mxu0 %v82_v24 }
  0x56   :  { %1981 = vmatmul.mubr.f32.gmra.mxu0 %v83_v25 }
  0x57   :  { %1983 = vmatprep.mubr.f32.mxu0 %v84_v26 }
  0x5a   :  { %1984 = vmatmul.mubr.f32.gmra.mxu0 %v85_v27 }
  0x5b   :  { %1986 = vmatprep.mubr.f32.mxu0 %v86_v28 }
  0x5e   :  { %1987 = vmatmul.mubr.f32.gmra.mxu0 %v87_v29 }
  0x5f   :  { %1989 = vmatprep.mubr.f32.mxu0 %v88_v30 }
  0x62   :  { %1990 = vmatmul.mubr.f32.gmra.mxu0 %v89_v31 }
  0x63   :  { %1992 = vmatprep.mubr.f32.mxu0 %v90_v32 }
  0x66   :  { %1993 = vmatmul.mubr.f32.gmra.mxu0 %v91_v33 }
  0x67   :  { %1995 = vmatprep.mubr.f32.mxu0 %v92_v34 }
  0x6a   :  { %1996 = vmatmul.mubr.f32.gmra.mxu0 %v93_v35 }
  0x6b   :  { %1998 = vmatprep.mubr.f32.mxu0 %v94_v36 }
  0x6e   :  { %1999 = vmatmul.mubr.f32.gmra.mxu0 %v95_v37 }
  0x6f   :  { %2001 = vmatprep.mubr.f32.mxu0 %v96_v38 }
  0x72   :  { %2002 = vmatmul.mubr.f32.gmra.mxu0 %v97_v39 }
  0x73   :  { %2004 = vmatprep.mubr.f32.mxu0 %v98_v40 }
  0x76   :  { %2005 = vmatmul.mubr.f32.gmra.mxu0 %v99_v41 }
  0x77   :  { %2007 = vmatprep.mubr.f32.mxu0 %v100_v42 }
  0x7a   :  { %2008 = vmatmul.mubr.f32.gmra.mxu0 %v101_v43 }
  0x7b   :  { %2010 = vmatprep.mubr.f32.mxu0 %v102_v44 }
  0x7e   :  { %2011 = vmatmul.mubr.f32.gmra.mxu0 %v103_v45 }
  0x7f   :  { %2013 = vmatprep.mubr.f32.mxu0 %v104_v46 }
  0x82   :  { %2014 = vmatmul.mubr.f32.gmra.mxu0 %v105_v47 }
 0x106   :  { %v2429_v49 = vpop.f32.mrf.mxu0 }
 0x107   :  { %v2574_v47 = vadd.f32 %v2429_v49, %v2450_v15 }
 0x108   :  { %v2431_v50 = vpop.f32.mrf.mxu0 }
 0x10a   :  { %v2433_v51 = vpop.f32.mrf.mxu0 }
 0x10b   :  { %v2554_v43 = vadd.f32 %v2433_v51, %v2450_v15 }
 0x10c   :  { %v2435_v52 = vpop.f32.mrf.mxu0 }
 0x10d   :  { %v2564_v45 = vadd.f32 %v2450_v15, %v2435_v52  ;;  %v2584_v52 = vadd.f32 %v2450_v15, %v2431_v50 }
 0x10e   :  { %v2437_v53 = vpop.f32.mrf.mxu0 }
 0x10f   :  { %v2536_v39 = vadd.f32 %v2437_v53, %v2450_v15 }
 0x110   :  { %v2439_v54 = vpop.f32.mrf.mxu0 }
 0x111   :  { %v2545_v41 = vadd.f32 %v2450_v15, %v2439_v54 }
 0x112   :  { %v1979_v55 = vpop.f32.mrf.mxu0 }
 0x113   :  { %v2519_v35 = vadd.f32 %v1979_v55, %v2450_v15 }
 0x114   :  { %v225_v56 = vpop.f32.mrf.mxu0 }
 0x115   :  { %v2527_v37 = vadd.f32 %v2450_v15, %v225_v56 }
 0x116   :  { %v1982_v57 = vpop.f32.mrf.mxu0 }
 0x117   :  { %v2503_v31 = vadd.f32 %v1982_v57, %v2450_v15 }
 0x118   :  { %v235_v58 = vpop.f32.mrf.mxu0 }
 0x119   :  { %v2511_v33 = vadd.f32 %v2450_v15, %v235_v58 }
 0x11a   :  { %v1985_v59 = vpop.f32.mrf.mxu0 }
 0x11b   :  { %v2487_v27 = vadd.f32 %v1985_v59, %v2450_v15 }
 0x11c   :  { %v245_v60 = vpop.f32.mrf.mxu0 }
 0x11d   :  { %v2495_v29 = vadd.f32 %v2450_v15, %v245_v60  ;;  %v435_v60 = vmul.f32 %v2487_v27, %v2487_v27 }
 0x11e   :  { %v1988_v61 = vpop.f32.mrf.mxu0 }
 0x11f   :  { %v2471_v23 = vadd.f32 %v1988_v61, %v2450_v15 }
 0x120   :  { %v255_v62 = vpop.f32.mrf.mxu0 }
 0x121   :  { %v2479_v25 = vadd.f32 %v2450_v15, %v255_v62  ;;  %v437_v56 = vmul.f32 %v2471_v23, %v2471_v23  ;;  %v434_v62 = vmul.f32 %v2495_v29, %v2495_v29 }
 0x122   :  { %v1991_v63 = vpop.f32.mrf.mxu0 }
 0x123   :  { %v2456_v18 = vadd.f32 %v1991_v63, %v2450_v15  ;;  %v436_v58 = vmul.f32 %v2479_v25, %v2479_v25 }
 0x124   :  { %v265_v0 = vpop.f32.mrf.mxu0 }
 0x125   :  { %v2463_v21 = vadd.f32 %v2450_v15, %v265_v0  ;;  %v439_v53 = vmul.f32 %v2456_v18, %v2456_v18  ;;  %v433_v0 = vmul.f32 %v2503_v31, %v2503_v31 }
 0x126   :  { %v2441_v1 = vpop.f32.mrf.mxu0 }
 0x127   :  { %v2569_v46 = vadd.f32 %v2441_v1, %v2450_v15  ;;  %v438_v50 = vmul.f32 %v2463_v21, %v2463_v21 }
 0x128   :  { %v2443_v2 = vpop.f32.mrf.mxu0 }
 0x129   :  { %v2579_v51 = vadd.f32 %v2450_v15, %v2443_v2  ;;  %v432_v2 = vmul.f32 %v2511_v33, %v2511_v33 }
 0x12a   :  { %v1997_v3 = vpop.f32.mrf.mxu0 }
 0x12b   :  { %v2549_v42 = vadd.f32 %v1997_v3, %v2450_v15 }
 0x12c   :  { %v2445_v4 = vpop.f32.mrf.mxu0 }
 0x12d   :  { %v2559_v44 = vadd.f32 %v2450_v15, %v2445_v4  ;;  %v431_v4 = vmul.f32 %v2519_v35, %v2519_v35 }
 0x12e   :  { %v2000_v5 = vpop.f32.mrf.mxu0 }
 0x12f   :  { %v2531_v38 = vadd.f32 %v2000_v5, %v2450_v15 }
 0x130   :  { %v295_v6 = vpop.f32.mrf.mxu0 }
 0x131   :  { %v2540_v40 = vadd.f32 %v2450_v15, %v295_v6  ;;  %v430_v6 = vmul.f32 %v2527_v37, %v2527_v37 }
 0x132   :  { %v2003_v7 = vpop.f32.mrf.mxu0 }
 0x133   :  { %v2515_v34 = vadd.f32 %v2003_v7, %v2450_v15  ;;  %v445_v7 = vmul.f32 %v2531_v38, %v2531_v38 }
 0x134   :  { %v305_v8 = vpop.f32.mrf.mxu0 }
 0x135   :  { %v2523_v36 = vadd.f32 %v2450_v15, %v305_v8  ;;  %v447_v3 = vmul.f32 %v2515_v34, %v2515_v34  ;;  %v429_v8 = vmul.f32 %v2536_v39, %v2536_v39 }
 0x136   :  { %v2006_v9 = vpop.f32.mrf.mxu0 }
 0x137   :  { %v2499_v30 = vadd.f32 %v2006_v9, %v2450_v15  ;;  %v446_v5 = vmul.f32 %v2523_v36, %v2523_v36  ;;  %v444_v9 = vmul.f32 %v2540_v40, %v2540_v40 }
 0x138   :  { %v315_v10 = vpop.f32.mrf.mxu0 }
 0x139   :  { %v2507_v32 = vadd.f32 %v2450_v15, %v315_v10  ;;  %v449_v63 = vmul.f32 %v2499_v30, %v2499_v30  ;;  %v428_v10 = vmul.f32 %v2545_v41, %v2545_v41 }
 0x13a   :  { %v2009_v11 = vpop.f32.mrf.mxu0 }
 0x13b   :  { %v2483_v26 = vadd.f32 %v2009_v11, %v2450_v15  ;;  %v448_v1 = vmul.f32 %v2507_v32, %v2507_v32  ;;  %v443_v11 = vmul.f32 %v2549_v42, %v2549_v42 }
 0x13c   :  { %v325_v12 = vpop.f32.mrf.mxu0 }
 0x13d   :  { %v2491_v28 = vadd.f32 %v2450_v15, %v325_v12  ;;  %v451_v59 = vmul.f32 %v2483_v26, %v2483_v26  ;;  %v427_v12 = vmul.f32 %v2554_v43, %v2554_v43 }
 0x13e   :  { %v2012_v13 = vpop.f32.mrf.mxu0 }
 0x13f   :  { %v2467_v22 = vadd.f32 %v2012_v13, %v2450_v15  ;;  %v450_v61 = vmul.f32 %v2491_v28, %v2491_v28  ;;  %v442_v13 = vmul.f32 %v2559_v44, %v2559_v44 }
 0x140   :  { %v335_v14 = vpop.f32.mrf.mxu0 }
 0x141   :  { %v2475_v24 = vadd.f32 %v2450_v15, %v335_v14  ;;  %v453_v55 = vmul.f32 %v2467_v22, %v2467_v22  ;;  %v426_v14 = vmul.f32 %v2564_v45, %v2564_v45 }
 0x142   :  { %v2015_v16 = vpop.f32.mrf.mxu0 }
 0x143   :  { %v2453_v17 = vadd.f32 %v2015_v16, %v2450_v15  ;;  %v452_v57 = vmul.f32 %v2475_v24, %v2475_v24  ;;  %v425_v16 = vmul.f32 %v2574_v47, %v2574_v47 }
 0x144   :  { %v345_v19 = vpop.f32.mrf.mxu0 }
 0x145   :  { %v2459_v20 = vadd.f32 %v2450_v15, %v345_v19  ;;  %1748 = vmatprep.subr.mxu1 %v2453_v17  ;;  %v455_v49 = vmul.f32 %v2453_v17, %v2453_v17  ;;  %v441_v15 = vmul.f32 %v2569_v46, %v2569_v46  ;;  %v440_v19 = vmul.f32 %v2579_v51, %v2579_v51 }
 0x146   :  { %1749 = vmatpush3.msra.mxu1 %v2456_v18 }
 0x147   :  { %1750 = vmatprep.subr.mxu1 %v2459_v20  ;;  %v454_v54 = vmul.f32 %v2459_v20, %v2459_v20 }
 0x148   :  { %1751 = vmatpush3.msra.mxu1 %v2463_v21 }
 0x149   :  { %1752 = vmatprep.subr.mxu1 %v2467_v22 }
 0x14a   :  { %1753 = vmatpush3.msra.mxu1 %v2471_v23 }
 0x14b   :  { %1754 = vmatprep.subr.mxu1 %v2475_v24 }
 0x14c   :  { %1755 = vmatpush3.msra.mxu1 %v2479_v25 }
 0x14d   :  { %1756 = vmatprep.subr.mxu1 %v2483_v26 }
 0x14e   :  { %1757 = vmatpush3.msra.mxu1 %v2487_v27 }
 0x14f   :  { %1758 = vmatprep.subr.mxu1 %v2491_v28 }
 0x150   :  { %1759 = vmatpush3.msra.mxu1 %v2495_v29 }
 0x151   :  { %1760 = vmatprep.subr.mxu1 %v2499_v30 }
 0x152   :  { %1761 = vmatpush3.msra.mxu1 %v2503_v31 }
 0x153   :  { %1762 = vmatprep.subr.mxu1 %v2507_v32 }
 0x154   :  { %1763 = vmatpush3.msra.mxu1 %v2511_v33 }
 0x155   :  { %1764 = vmatprep.subr.mxu1 %v2515_v34 }
 0x156   :  { %1765 = vmatpush3.msra.mxu1 %v2519_v35 }
 0x157   :  { %1766 = vmatprep.subr.mxu1 %v2523_v36 }
 0x158   :  { %1767 = vmatpush3.msra.mxu1 %v2527_v37 }
 0x159   :  { %1768 = vmatprep.subr.mxu1 %v2531_v38 }
 0x15a   :  { %1769 = vmatpush3.msra.mxu1 %v2536_v39 }
 0x15b   :  { %1770 = vmatprep.subr.mxu1 %v2540_v40 }
 0x15c   :  { %1771 = vmatpush3.msra.mxu1 %v2545_v41 }
 0x15d   :  { %1772 = vmatprep.subr.mxu1 %v2549_v42 }
 0x15e   :  { %1773 = vmatpush3.msra.mxu1 %v2554_v43 }
 0x15f   :  { %1774 = vmatprep.subr.mxu1 %v2559_v44 }
 0x160   :  { %1775 = vmatpush3.msra.mxu1 %v2564_v45 }
 0x161   :  { %1776 = vmatprep.subr.mxu1 %v2569_v46 }
 0x162   :  { %1777 = vmatpush3.msra.mxu1 %v2574_v47 }
 0x163   :  { %1778 = vmatprep.subr.mxu1 %v2579_v51 }
 0x164   :  { %1779 = vmatpush3.msra.mxu1 %v2584_v52 }
 0x165   :  { %419 = vmatmul.mubr.f32.vlgmr.msra.gmra.mxu1 %v3587_v48  ;;  %1783 = vmatprep.subr.mxu1 %v455_v49  ;;  %v424_v49 = vmul.f32 %v2584_v52, %v2584_v52 }
 0x166   :  { %1784 = vmatpush3.msra.mxu1 %v439_v53  ;;  %520 = vmatprep.mubr.f32.mxu1 %v3587_v48  ;;  %v858_v53 = vld [vmem:[#allocation7 + $0x78] sm:$0xff] }
 0x167   :  { %1785 = vmatprep.subr.mxu1 %v454_v54  ;;  %v857_v54 = vld [vmem:[#allocation7 + $0x70] sm:$0xff]  ;;  %2016 = vmatprep.subr.mxu0 %v858_v53 }
 0x168   :  { %1786 = vmatpush3.msra.mxu1 %v438_v50  ;;  %2017 = vmatpush3.msra.mxu0 %v858_v53  ;;  %v856_v50 = vld [vmem:[#allocation7 + $0x68] sm:$0xff] }
 0x169   :  { %1787 = vmatprep.subr.mxu1 %v453_v55  ;;  %2018 = vmatprep.subr.mxu0 %v857_v54  ;;  %v855_v55 = vld [vmem:[#allocation7 + $0x60] sm:$0xff] }
 0x16a   :  { %1788 = vmatpush3.msra.mxu1 %v437_v56  ;;  %2019 = vmatpush3.msra.mxu0 %v857_v54  ;;  %v854_v56 = vld [vmem:[#allocation7 + $0x58] sm:$0xff] }
 0x16b   :  { %1789 = vmatprep.subr.mxu1 %v452_v57  ;;  %2020 = vmatprep.subr.mxu0 %v856_v50  ;;  %v853_v57 = vld [vmem:[#allocation7 + $0x50] sm:$0xff] }
 0x16c   :  { %1790 = vmatpush3.msra.mxu1 %v436_v58  ;;  %2021 = vmatpush3.msra.mxu0 %v856_v50  ;;  %v852_v58 = vld [vmem:[#allocation7 + $0x48] sm:$0xff] }
 0x16d   :  { %1791 = vmatprep.subr.mxu1 %v451_v59  ;;  %2022 = vmatprep.subr.mxu0 %v855_v55  ;;  %v851_v59 = vld [vmem:[#allocation7 + $0x40] sm:$0xff] }
 0x16e   :  { %1792 = vmatpush3.msra.mxu1 %v435_v60  ;;  %2023 = vmatpush3.msra.mxu0 %v855_v55  ;;  %v850_v60 = vld [vmem:[#allocation7 + $0x38] sm:$0xff] }
 0x16f   :  { %1793 = vmatprep.subr.mxu1 %v450_v61  ;;  %2024 = vmatprep.subr.mxu0 %v854_v56  ;;  %v849_v61 = vld [vmem:[#allocation7 + $0x30] sm:$0xff] }
 0x170   :  { %1794 = vmatpush3.msra.mxu1 %v434_v62  ;;  %2025 = vmatpush3.msra.mxu0 %v854_v56  ;;  %v848_v62 = vld [vmem:[#allocation7 + $0x28] sm:$0xff] }
 0x171   :  { %1795 = vmatprep.subr.mxu1 %v449_v63  ;;  %2026 = vmatprep.subr.mxu0 %v853_v57  ;;  %v847_v63 = vld [vmem:[#allocation7 + $0x20] sm:$0xff] }
 0x172   :  { %1796 = vmatpush3.msra.mxu1 %v433_v0  ;;  %2027 = vmatpush3.msra.mxu0 %v853_v57  ;;  %v846_v0 = vld [vmem:[#allocation7 + $0x18] sm:$0xff] }
 0x173   :  { %1797 = vmatprep.subr.mxu1 %v448_v1  ;;  %2028 = vmatprep.subr.mxu0 %v852_v58  ;;  %v845_v1 = vld [vmem:[#allocation7 + $0x10] sm:$0xff] }
 0x174   :  { %1798 = vmatpush3.msra.mxu1 %v432_v2  ;;  %2029 = vmatpush3.msra.mxu0 %v852_v58  ;;  %v844_v2 = vld [vmem:[#allocation7 + $0x8] sm:$0xff] }
 0x175   :  { %1799 = vmatprep.subr.mxu1 %v447_v3  ;;  %2030 = vmatprep.subr.mxu0 %v851_v59  ;;  %v843_v3 = vld [vmem:[#allocation7] sm:$0xff] }
 0x176   :  { %1800 = vmatpush3.msra.mxu1 %v431_v4  ;;  %2031 = vmatpush3.msra.mxu0 %v851_v59 }
 0x177   :  { %1801 = vmatprep.subr.mxu1 %v446_v5  ;;  %2032 = vmatprep.subr.mxu0 %v850_v60 }
 0x178   :  { %1802 = vmatpush3.msra.mxu1 %v430_v6  ;;  %2033 = vmatpush3.msra.mxu0 %v850_v60 }
 0x179   :  { %1803 = vmatprep.subr.mxu1 %v445_v7  ;;  %2034 = vmatprep.subr.mxu0 %v849_v61 }
 0x17a   :  { %1804 = vmatpush3.msra.mxu1 %v429_v8  ;;  %2035 = vmatpush3.msra.mxu0 %v849_v61 }
 0x17b   :  { %1805 = vmatprep.subr.mxu1 %v444_v9  ;;  %2036 = vmatprep.subr.mxu0 %v848_v62 }
 0x17c   :  { %1806 = vmatpush3.msra.mxu1 %v428_v10  ;;  %2037 = vmatpush3.msra.mxu0 %v848_v62 }
 0x17d   :  { %1807 = vmatprep.subr.mxu1 %v443_v11  ;;  %2038 = vmatprep.subr.mxu0 %v847_v63 }
 0x17e   :  { %1808 = vmatpush3.msra.mxu1 %v427_v12  ;;  %2039 = vmatpush3.msra.mxu0 %v847_v63 }
 0x17f   :  { %1809 = vmatprep.subr.mxu1 %v442_v13  ;;  %2040 = vmatprep.subr.mxu0 %v846_v0 }
 0x180   :  { %1810 = vmatpush3.msra.mxu1 %v426_v14  ;;  %2041 = vmatpush3.msra.mxu0 %v846_v0 }
 0x181   :  { %1811 = vmatprep.subr.mxu1 %v441_v15  ;;  %2042 = vmatprep.subr.mxu0 %v845_v1 }
 0x182   :  { %1812 = vmatpush3.msra.mxu1 %v425_v16  ;;  %2043 = vmatpush3.msra.mxu0 %v845_v1  ;;  %v533_v16 = vlaneseq }
 0x183   :  { %1813 = vmatprep.subr.mxu1 %v440_v19  ;;  %2044 = vmatprep.subr.mxu0 %v844_v2 }
 0x184   :  { %1814 = vmatpush3.msra.mxu1 %v424_v49  ;;  %2045 = vmatpush3.msra.mxu0 %v844_v2  ;;  %v534_v19 = vshrl.u32 %v533_v16, 7 }
 0x185   :  { %521 = vmatmul.mubr.f32.vlgmr.msra.gmra.mxu1 %v3587_v48  ;;  %2046 = vmatprep.subr.mxu0 %v843_v3 }
 0x186   :  { %1155 = vmatprep.mubr.f32.mxu1 %v3587_v48  ;;  %2047 = vmatpush3.msra.mxu0 %v843_v3  ;;  %v2657_v49 = vsub.s32 0, %v534_v19 }
 0x225   :  { %v1780_v4 = vpop.f32.mrf.mxu1 }
 0x227   :  { %v1781_v5 = vpop.f32.mrf.mxu1 }
 0x228   :  { %v1782_v6 = vadd.f32 %v1781_v5, %v1780_v4  ;;  %v2702_v5 = vld [vmem:[%s3581_s4] ss:$0 sm:$0xff] }
 0x22a   :  { %v528_v8 = vmul.f32 0.00390625, %v1782_v6 }
 0x22c   :  { %v530_v11 = vmul.f32 %v528_v8, %v528_v8  ;;  %v2660_v54 = vrot.slane %v528_v8, %v2657_v49 }
 0x22e   :  { %v537_v55 = vsub.f32 %v2584_v52, %v2660_v54  ;;  %v538_v56 = vsub.f32 %v2574_v47, %v2660_v54  ;;  %v539_v57 = vsub.f32 %v2564_v45, %v2660_v54  ;;  %v540_v58 = vsub.f32 %v2554_v43, %v2660_v54  ;;  %v2684_v45 = vld [vmem:[%s3580_s3] ss:$0 sm:$0xff] }
 0x22f   :  { %v541_v59 = vsub.f32 %v2545_v41, %v2660_v54  ;;  %v542_v60 = vsub.f32 %v2536_v39, %v2660_v54  ;;  %v543_v43 = vsub.f32 %v2527_v37, %v2660_v54  ;;  %v544_v63 = vsub.f32 %v2519_v35, %v2660_v54 }
 0x230   :  { %v545_v0 = vsub.f32 %v2511_v33, %v2660_v54  ;;  %v546_v35 = vsub.f32 %v2503_v31, %v2660_v54  ;;  %v547_v33 = vsub.f32 %v2495_v29, %v2660_v54  ;;  %v548_v6 = vsub.f32 %v2487_v27, %v2660_v54 }
 0x231   :  { %v549_v8 = vsub.f32 %v2479_v25, %v2660_v54  ;;  %v551_v31 = vsub.f32 %v2463_v21, %v2660_v54  ;;  %v552_v29 = vsub.f32 %v2456_v18, %v2660_v54  ;;  %v553_v21 = vsub.f32 %v2579_v51, %v2660_v54 }
 0x245   :  { %v1815_v7 = vpop.f32.mrf.mxu1 }
 0x247   :  { %v1816_v9 = vpop.f32.mrf.mxu1 }
 0x248   :  { %v1817_v10 = vadd.f32 %v1816_v9, %v1815_v7  ;;  %v550_v9 = vsub.f32 %v2471_v23, %v2660_v54 }
 0x24a   :  { %v529_v12 = vmul.f32 0.00390625, %v1817_v10 }
 0x24c   :  { %v531_v13 = vsub.f32 %v529_v12, %v530_v11 }
 0x24e   :  { %v532_v14 = vmax.f32 %v531_v13, 0.0 }
 0x250   :  { %v569_v15 = vadd.f32 1e-05, %v532_v14 }
 0x252   :  { %2103 = vrsqrt.f32 %v569_v15 }
 0x25f   :  { %v2104_v53 = vpop.eup %2103 }
 0x260   :  { %v2663_v50 = vrot.slane %v2104_v53, %v2657_v49 }
 0x262   :  { %v575_v61 = vmul.f32 %v2663_v50, %v537_v55  ;;  %v576_v62 = vmul.f32 %v2663_v50, %v538_v56  ;;  %v577_v52 = vmul.f32 %v2663_v50, %v539_v57  ;;  %v578_v47 = vmul.f32 %v2663_v50, %v540_v58 }
 0x263   :  { %v579_v41 = vmul.f32 %v2663_v50, %v541_v59  ;;  %v580_v39 = vmul.f32 %v2663_v50, %v542_v60  ;;  %v581_v1 = vmul.f32 %v2663_v50, %v543_v43  ;;  %v582_v10 = vmul.f32 %v2663_v50, %v544_v63 }
 0x264   :  { %v613_v2 = vmul.f32 %v2684_v45, %v575_v61  ;;  %v614_v3 = vmul.f32 %v2684_v45, %v576_v62  ;;  %v615_v4 = vmul.f32 %v2684_v45, %v577_v52  ;;  %v616_v37 = vmul.f32 %v2684_v45, %v578_v47 }
 0x265   :  { %v617_v7 = vmul.f32 %v2684_v45, %v579_v41  ;;  %v618_v11 = vmul.f32 %v2684_v45, %v580_v39  ;;  %v583_v27 = vmul.f32 %v2663_v50, %v545_v0  ;;  %v619_v12 = vmul.f32 %v2684_v45, %v581_v1 }
 0x266   :  { %v2724_v13 = vadd.f32 %v2702_v5, %v614_v3  ;;  %v2727_v25 = vadd.f32 %v2702_v5, %v613_v2  ;;  %v2730_v23 = vadd.f32 %v2702_v5, %v615_v4  ;;  %v2733_v14 = vadd.f32 %v2702_v5, %v616_v37 }
 0x267   :  { %v584_v18 = vmul.f32 %v2663_v50, %v546_v35  ;;  %v585_v15 = vmul.f32 %v2663_v50, %v547_v33  ;;  %v2740_v16 = vadd.f32 %v2702_v5, %v617_v7  ;;  %v620_v19 = vmul.f32 %v2684_v45, %v582_v10 }
 0x268   :  { %v716_v53 = vmul.f32 0.70710677, %v2724_v13  ;;  %v715_v55 = vmul.f32 0.70710677, %v2727_v25  ;;  %v2746_v56 = vadd.f32 %v2702_v5, %v618_v11  ;;  %v621_v57 = vmul.f32 %v2684_v45, %v583_v27 }
 0x269   :  { %v717_v51 = vmul.f32 0.70710677, %v2730_v23  ;;  %v718_v58 = vmul.f32 0.70710677, %v2733_v14  ;;  %v2752_v59 = vadd.f32 %v2702_v5, %v619_v12  ;;  %v554_v60 = vsub.f32 %v2569_v46, %v2660_v54 }
 0x26a   :  { %v555_v61 = vsub.f32 %v2559_v44, %v2660_v54  ;;  %2105 = verf.f32 %v716_v53  ;;  %v719_v62 = vmul.f32 0.70710677, %v2740_v16  ;;  %v556_v52 = vsub.f32 %v2549_v42, %v2660_v54 }
 0x26b   :  { %v586_v47 = vmul.f32 %v2663_v50, %v548_v6  ;;  %v587_v43 = vmul.f32 %v2663_v50, %v549_v8  ;;  %2107 = verf.f32 %v715_v55  ;;  %v622_v41 = vmul.f32 %v2684_v45, %v584_v18 }
 0x26c   :  { %2109 = verf.f32 %v717_v51  ;;  %v720_v39 = vmul.f32 0.70710677, %v2746_v56  ;;  %v2766_v46 = vadd.f32 %v2702_v5, %v620_v19  ;;  %v623_v44 = vmul.f32 %v2684_v45, %v585_v15 }
 0x26d   :  { %2111 = verf.f32 %v718_v58  ;;  %v721_v63 = vmul.f32 0.70710677, %v2752_v59  ;;  %v2771_v42 = vadd.f32 %v2702_v5, %v621_v57  ;;  %v557_v0 = vsub.f32 %v2540_v40, %v2660_v54 }
 0x26e   :  { %v558_v1 = vsub.f32 %v2531_v38, %v2660_v54  ;;  %v559_v2 = vsub.f32 %v2523_v36, %v2660_v54  ;;  %2113 = verf.f32 %v719_v62  ;;  %v560_v3 = vsub.f32 %v2515_v34, %v2660_v54 }
 0x26f   :  { %v561_v4 = vsub.f32 %v2507_v32, %v2660_v54  ;;  %v588_v37 = vmul.f32 %v2663_v50, %v550_v9  ;;  %v589_v35 = vmul.f32 %v2663_v50, %v551_v31  ;;  %v624_v33 = vmul.f32 %v2684_v45, %v586_v47 }
 0x270   :  { %2115 = verf.f32 %v720_v39  ;;  %v722_v40 = vmul.f32 0.70710677, %v2766_v46  ;;  %v2788_v6 = vadd.f32 %v2702_v5, %v622_v41  ;;  %v625_v7 = vmul.f32 %v2684_v45, %v587_v43 }
 0x271   :  { %2117 = verf.f32 %v721_v63  ;;  %v723_v8 = vmul.f32 0.70710677, %v2771_v42  ;;  %v2793_v10 = vadd.f32 %v2702_v5, %v623_v44  ;;  %v562_v9 = vsub.f32 %v2499_v30, %v2660_v54 }
 0x272   :  { %v563_v11 = vsub.f32 %v2491_v28, %v2660_v54  ;;  %v564_v31 = vsub.f32 %v2483_v26, %v2660_v54  ;;  %v565_v27 = vsub.f32 %v2475_v24, %v2660_v54  ;;  %v566_v12 = vsub.f32 %v2467_v22, %v2660_v54 }
 0x273   :  { %v590_v15 = vmul.f32 %v2663_v50, %v552_v29  ;;  %v591_v19 = vmul.f32 %v2663_v50, %v553_v21  ;;  %v626_v53 = vmul.f32 %v2684_v45, %v588_v37  ;;  %2119 = verf.f32 %v722_v40 }
 0x274   :  { %v724_v55 = vmul.f32 0.70710677, %v2788_v6  ;;  %v2812_v57 = vadd.f32 %v2702_v5, %v624_v33  ;;  %v627_v51 = vmul.f32 %v2684_v45, %v589_v35  ;;  %2121 = verf.f32 %v723_v8 }
 0x275   :  { %v725_v58 = vmul.f32 0.70710677, %v2793_v10  ;;  %v2817_v62 = vadd.f32 %v2702_v5, %v625_v7  ;;  %v592_v21 = vmul.f32 %v2663_v50, %v554_v60  ;;  %v593_v47 = vmul.f32 %v2663_v50, %v555_v61 }
 0x276   :  { %v594_v43 = vmul.f32 %v2663_v50, %v556_v52  ;;  %v628_v39 = vmul.f32 %v2684_v45, %v590_v15  ;;  %v629_v44 = vmul.f32 %v2684_v45, %v591_v19  ;;  %v684_v63 = vmul.f32 0.5, %v2724_v13 }
 0x277   :  { %v2106_v41 = vpop.eup %2105  ;;  %v683_v37 = vmul.f32 0.5, %v2727_v25  ;;  %2123 = verf.f32 %v724_v55  ;;  %v726_v40 = vmul.f32 0.70710677, %v2812_v57  ;;  %v2830_v60 = vadd.f32 %v2702_v5, %v626_v53 }
 0x278   :  { %v2108_v35 = vpop.eup %2107  ;;  %v780_v33 = vadd.f32 1.0, %v2106_v41  ;;  %2125 = verf.f32 %v725_v58  ;;  %v727_v52 = vmul.f32 0.70710677, %v2817_v62  ;;  %v2834_v8 = vadd.f32 %v2702_v5, %v627_v51 }
 0x279   :  { %v2110_v61 = vpop.eup %2109  ;;  %v779_v7 = vadd.f32 1.0, %v2108_v35  ;;  %v595_v13 = vmul.f32 %v2663_v50, %v557_v0  ;;  %v630_v25 = vmul.f32 %v2684_v45, %v592_v21  ;;  %v631_v48 = vmul.f32 %v2684_v45, %v593_v47 }
 0x27a   :  { %v2112_v15 = vpop.eup %2111  ;;  %v812_v19 = vmul.f32 %v780_v33, %v684_v63  ;;  %v781_v55 = vadd.f32 1.0, %v2110_v61  ;;  %v685_v29 = vmul.f32 0.5, %v2730_v23  ;;  %v2841_v58 = vadd.f32 %v2702_v5, %v628_v39 }
 0x27b   :  { %v2114_v41 = vpop.eup %2113  ;;  %v811_v53 = vmul.f32 %v779_v7, %v683_v37  ;;  %v782_v35 = vadd.f32 1.0, %v2112_v15  ;;  %2127 = verf.f32 %v726_v40  ;;  %v728_v51 = vmul.f32 0.70710677, %v2830_v60 }
 0x27c   :  { %v2845_v18 = vadd.f32 %v2702_v5, %v629_v44  ;;  %v813_v21 = vmul.f32 %v781_v55, %v685_v29  ;;  %v783_v63 = vadd.f32 1.0, %v2114_v41  ;;  %2129 = verf.f32 %v727_v52 }
 0x27d   :  { %v2116_v0 = vpop.eup %2115  ;;  %2048 = vmatprep.mubr.f32.mxu0 %v811_v53  ;;  %v729_v47 = vmul.f32 0.70710677, %v2834_v8  ;;  %v596_v23 = vmul.f32 %v2663_v50, %v558_v1  ;;  %v597_v39 = vmul.f32 %v2663_v50, %v559_v2  ;;  %v632_v44 = vmul.f32 %v2684_v45, %v594_v43 }
 0x27e   :  { %v2118_v37 = vpop.eup %2117  ;;  %2049 = vmatmul.mubr.f32.vlgmr.msra.gmra.mxu0 %v812_v19  ;;  %v686_v29 = vmul.f32 0.5, %v2733_v14  ;;  %v633_v33 = vmul.f32 %v2684_v45, %v595_v13  ;;  %v687_v40 = vmul.f32 0.5, %v2740_v16  ;;  %v730_v61 = vmul.f32 0.70710677, %v2841_v58 }
 0x27f   :  { %2051 = vmatprep.mubr.f32.mxu0 %v813_v21  ;;  %v2862_v38 = vadd.f32 %v2702_v5, %v630_v25  ;;  %v784_v7 = vadd.f32 1.0, %v2116_v0  ;;  %2131 = verf.f32 %v728_v51  ;;  %v731_v36 = vmul.f32 0.70710677, %v2845_v18 }
 0x280   :  { %v814_v1 = vmul.f32 %v782_v35, %v686_v29  ;;  %v2120_v2 = vpop.eup %2119  ;;  %v815_v43 = vmul.f32 %v783_v63, %v687_v40  ;;  %v785_v52 = vadd.f32 1.0, %v2118_v37  ;;  %2133 = verf.f32 %v729_v47 }
 0x281   :  { %v2866_v14 = vadd.f32 %v2702_v5, %v631_v48  ;;  %v2122_v15 = vpop.eup %2121  ;;  %v598_v16 = vmul.f32 %v2663_v50, %v560_v3  ;;  %v599_v13 = vmul.f32 %v2663_v50, %v561_v4  ;;  %v634_v25 = vmul.f32 %v2684_v45, %v596_v23 }
 0x282   :  { %2052 = vmatmul.mubr.f32.gmra.mxu0 %v814_v1  ;;  %v688_v19 = vmul.f32 0.5, %v2746_v56  ;;  %v635_v55 = vmul.f32 %v2684_v45, %v597_v39  ;;  %v689_v48 = vmul.f32 0.5, %v2752_v59  ;;  %2135 = verf.f32 %v730_v61 }
 0x283   :  { %2054 = vmatprep.mubr.f32.mxu0 %v815_v43  ;;  %v732_v34 = vmul.f32 0.70710677, %v2862_v38  ;;  %v786_v3 = vadd.f32 1.0, %v2120_v2  ;;  %2137 = verf.f32 %v731_v36  ;;  %v2882_v32 = vadd.f32 %v2702_v5, %v632_v44 }
 0x284   :  { %v816_v41 = vmul.f32 %v784_v7, %v688_v19  ;;  %v2124_v4 = vpop.eup %2123  ;;  %v817_v53 = vmul.f32 %v785_v52, %v689_v48  ;;  %v787_v35 = vadd.f32 1.0, %v2122_v15  ;;  %v733_v51 = vmul.f32 0.70710677, %v2866_v14 }
 0x285   :  { %v2886_v56 = vadd.f32 %v2702_v5, %v633_v33  ;;  %v2126_v0 = vpop.eup %2125  ;;  %v600_v59 = vmul.f32 %v2663_v50, %v562_v9  ;;  %v601_v21 = vmul.f32 %v2663_v50, %v563_v11  ;;  %v636_v63 = vmul.f32 %v2684_v45, %v598_v16 }
 0x286   :  { %2055 = vmatmul.mubr.f32.gmra.mxu0 %v816_v41  ;;  %v690_v47 = vmul.f32 0.5, %v2766_v46  ;;  %v637_v37 = vmul.f32 %v2684_v45, %v599_v13  ;;  %v691_v23 = vmul.f32 0.5, %v2771_v42  ;;  %2139 = verf.f32 %v732_v34 }
 0x287   :  { %2057 = vmatprep.mubr.f32.mxu0 %v817_v53  ;;  %v2901_v30 = vadd.f32 %v2702_v5, %v634_v25  ;;  %v788_v39 = vadd.f32 1.0, %v2124_v4  ;;  %v734_v28 = vmul.f32 0.70710677, %v2882_v32  ;;  %v2905_v11 = vadd.f32 %v2702_v5, %v635_v55 }
 0x288   :  { %v818_v9 = vmul.f32 %v786_v3, %v690_v47  ;;  %v2128_v44 = vpop.eup %2127  ;;  %v819_v29 = vmul.f32 %v787_v35, %v691_v23  ;;  %v789_v33 = vadd.f32 1.0, %v2126_v0  ;;  %2141 = verf.f32 %v733_v51 }
 0x289   :  { %v735_v46 = vmul.f32 0.70710677, %v2886_v56  ;;  %v2130_v40 = vpop.eup %2129  ;;  %v602_v42 = vmul.f32 %v2663_v50, %v564_v31  ;;  %v603_v61 = vmul.f32 %v2663_v50, %v565_v27  ;;  %v638_v1 = vmul.f32 %v2684_v45, %v600_v59 }
 0x28a   :  { %2058 = vmatmul.mubr.f32.gmra.mxu0 %v818_v9  ;;  %v692_v7 = vmul.f32 0.5, %v2788_v6  ;;  %v639_v36 = vmul.f32 %v2684_v45, %v601_v21  ;;  %v693_v2 = vmul.f32 0.5, %v2793_v10  ;;  %v736_v43 = vmul.f32 0.70710677, %v2901_v30 }
 0x28b   :  { %2060 = vmatprep.mubr.f32.mxu0 %v819_v29  ;;  %v2922_v26 = vadd.f32 %v2702_v5, %v636_v63  ;;  %v790_v52 = vadd.f32 1.0, %v2128_v44  ;;  %2143 = verf.f32 %v734_v28  ;;  %v737_v24 = vmul.f32 0.70710677, %v2905_v11 }
 0x28c   :  { %v820_v31 = vmul.f32 %v788_v39, %v692_v7  ;;  %v2132_v27 = vpop.eup %2131  ;;  %v821_v15 = vmul.f32 %v789_v33, %v693_v2  ;;  %v791_v16 = vadd.f32 1.0, %v2130_v40  ;;  %2145 = verf.f32 %v735_v46 }
 0x28d   :  { %v2926_v6 = vadd.f32 %v2702_v5, %v637_v37  ;;  %v2134_v13 = vpop.eup %2133  ;;  %v604_v10 = vmul.f32 %v2663_v50, %v566_v12  ;;  %v3589_v25 = vsub.f32 %v2459_v20, %v2660_v54  ;;  %v640_v55 = vmul.f32 %v2684_v45, %v602_v42 }
 0x28e   :  { %2061 = vmatmul.mubr.f32.gmra.mxu0 %v820_v31  ;;  %v694_v48 = vmul.f32 0.5, %v2812_v57  ;;  %v695_v34 = vmul.f32 0.5, %v2817_v62  ;;  %2147 = verf.f32 %v736_v43  ;;  %v738_v41 = vmul.f32 0.70710677, %v2922_v26 }
 0x28f   :  { %v605_v19 = vmul.f32 %v2663_v50, %v3589_v25  ;;  %2063 = vmatprep.mubr.f32.mxu0 %v821_v15  ;;  %v2941_v22 = vadd.f32 %v2702_v5, %v638_v1  ;;  %v2136_v12 = vpop.eup %2135  ;;  %v641_v3 = vmul.f32 %v2684_v45, %v603_v61  ;;  %v792_v4 = vadd.f32 1.0, %v2132_v27 }
 0x290   :  { %v822_v20 = vmul.f32 %v790_v52, %v694_v48  ;;  %2149 = verf.f32 %v737_v24  ;;  %v2138_v53 = vpop.eup %2137  ;;  %v823_v35 = vmul.f32 %v791_v16, %v695_v34  ;;  %v793_v51 = vadd.f32 1.0, %v2134_v13 }
 0x291   :  { %v739_v57 = vmul.f32 0.70710677, %v2926_v6  ;;  %v2946_v0 = vadd.f32 %v2702_v5, %v639_v36  ;;  %v3590_v62 = vsub.f32 %v2453_v17, %v2660_v54  ;;  %v642_v21 = vmul.f32 %v2684_v45, %v604_v10 }
 0x292   :  { %2064 = vmatmul.mubr.f32.gmra.mxu0 %v822_v20  ;;  %v696_v63 = vmul.f32 0.5, %v2830_v60  ;;  %v643_v47 = vmul.f32 %v2684_v45, %v605_v19  ;;  %v697_v37 = vmul.f32 0.5, %v2834_v8  ;;  %2151 = verf.f32 %v738_v41 }
 0x293   :  { %v606_v59 = vmul.f32 %v2663_v50, %v3590_v62  ;;  %2066 = vmatprep.mubr.f32.mxu0 %v823_v35  ;;  %v740_v23 = vmul.f32 0.70710677, %v2941_v22  ;;  %v2140_v9 = vpop.eup %2139  ;;  %v794_v28 = vadd.f32 1.0, %v2136_v12  ;;  %v795_v44 = vadd.f32 1.0, %v2138_v53 }
 0x294   :  { %v824_v39 = vmul.f32 %v792_v4, %v696_v63  ;;  %v2958_v17 = vadd.f32 %v2702_v5, %v640_v55  ;;  %v825_v54 = vmul.f32 %v793_v51, %v697_v37  ;;  %2153 = verf.f32 %v739_v57 }
 0x295   :  { %v741_v50 = vmul.f32 0.70710677, %v2946_v0  ;;  %v2962_v60 = vadd.f32 %v2702_v5, %v641_v3  ;;  %v2142_v29 = vpop.eup %2141  ;;  %v698_v8 = vmul.f32 0.5, %v2841_v58  ;;  %v699_v33 = vmul.f32 0.5, %v2845_v18 }
 0x296   :  { %2067 = vmatmul.mubr.f32.gmra.mxu0 %v824_v39  ;;  %v644_v46 = vmul.f32 %v2684_v45, %v606_v59  ;;  %v700_v40 = vmul.f32 0.5, %v2862_v38  ;;  %v796_v42 = vadd.f32 1.0, %v2140_v9  ;;  %2155 = verf.f32 %v740_v23 }
 0x297   :  { %2069 = vmatprep.mubr.f32.mxu0 %v825_v54  ;;  %v826_v61 = vmul.f32 %v794_v28, %v698_v8  ;;  %v827_v1 = vmul.f32 %v795_v44, %v699_v33  ;;  %v742_v7 = vmul.f32 0.70710677, %v2958_v17  ;;  %v2970_v36 = vadd.f32 %v2702_v5, %v642_v21 }
 0x298   :  { %v2144_v2 = vpop.eup %2143  ;;  %v797_v43 = vadd.f32 1.0, %v2142_v29  ;;  %2157 = verf.f32 %v741_v50  ;;  %v743_v58 = vmul.f32 0.70710677, %v2962_v60  ;;  %v2974_v18 = vadd.f32 %v2702_v5, %v643_v47 }
 0x299   :  { %v2146_v45 = vpop.eup %2145  ;;  %v828_v38 = vmul.f32 %v796_v42, %v700_v40  ;;  %v701_v31 = vmul.f32 0.5, %v2866_v14  ;;  %v798_v24 = vadd.f32 1.0, %v2144_v2  ;;  %2159 = verf.f32 %v742_v7 }
 0x29a   :  { %2070 = vmatmul.mubr.f32.gmra.mxu0 %v826_v61  ;;  %v744_v27 = vmul.f32 0.70710677, %v2970_v36  ;;  %v2979_v15 = vadd.f32 %v2702_v5, %v644_v46  ;;  %v799_v10 = vadd.f32 1.0, %v2146_v45  ;;  %2161 = verf.f32 %v743_v58 }
 0x29b   :  { %2072 = vmatprep.mubr.f32.mxu0 %v827_v1  ;;  %v2148_v52 = vpop.eup %2147  ;;  %v829_v13 = vmul.f32 %v797_v43, %v701_v31  ;;  %v745_v25 = vmul.f32 0.70710677, %v2974_v18  ;;  %v702_v19 = vmul.f32 0.5, %v2882_v32  ;;  %v703_v14 = vmul.f32 0.5, %v2886_v56 }
 0x29c   :  { %v800_v34 = vadd.f32 1.0, %v2148_v52  ;;  %2163 = verf.f32 %v744_v27  ;;  %v746_v41 = vmul.f32 0.70710677, %v2979_v15  ;;  %v704_v20 = vmul.f32 0.5, %v2901_v30 }
 0x29d   :  { %v2150_v16 = vpop.eup %2149  ;;  %v830_v48 = vmul.f32 %v798_v24, %v702_v19  ;;  %v831_v5 = vmul.f32 %v799_v10, %v703_v14  ;;  %2165 = verf.f32 %v745_v25  ;;  %v705_v4 = vmul.f32 0.5, %v2905_v11 }
 0x29e   :  { %2073 = vmatmul.mubr.f32.gmra.mxu0 %v828_v38  ;;  %v801_v12 = vadd.f32 1.0, %v2150_v16  ;;  %v832_v53 = vmul.f32 %v800_v34, %v704_v20  ;;  %2167 = verf.f32 %v746_v41  ;;  %v706_v62 = vmul.f32 0.5, %v2922_v26 }
 0x29f   :  { %2075 = vmatprep.mubr.f32.mxu0 %v829_v13  ;;  %v2152_v55 = vpop.eup %2151  ;;  %v707_v59 = vmul.f32 0.5, %v2926_v6  ;;  %v708_v11 = vmul.f32 0.5, %v2941_v22  ;;  %v709_v9 = vmul.f32 0.5, %v2946_v0  ;;  %v710_v6 = vmul.f32 0.5, %v2958_v17 }
 0x2a0   :  { %v802_v35 = vadd.f32 1.0, %v2152_v55  ;;  %v833_v56 = vmul.f32 %v801_v12, %v705_v4  ;;  %v711_v29 = vmul.f32 0.5, %v2962_v60  ;;  %v712_v0 = vmul.f32 0.5, %v2970_v36 }
 0x2a1   :  { %v2154_v3 = vpop.eup %2153  ;;  %v713_v42 = vmul.f32 0.5, %v2974_v18  ;;  %v714_v17 = vmul.f32 0.5, %v2979_v15 }
 0x2a2   :  { %2076 = vmatmul.mubr.f32.gmra.mxu0 %v830_v48  ;;  %v803_v51 = vadd.f32 1.0, %v2154_v3  ;;  %v834_v21 = vmul.f32 %v802_v35, %v706_v62 }
 0x2a3   :  { %2078 = vmatprep.mubr.f32.mxu0 %v831_v5  ;;  %v2156_v32 = vpop.eup %2155 }
 0x2a4   :  { %v804_v63 = vadd.f32 1.0, %v2156_v32  ;;  %v835_v30 = vmul.f32 %v803_v51, %v707_v59 }
 0x2a5   :  { %v2158_v57 = vpop.eup %2157 }
 0x2a6   :  { %2079 = vmatmul.mubr.f32.gmra.mxu0 %v832_v53  ;;  %v2160_v47 = vpop.eup %2159  ;;  %v805_v37 = vadd.f32 1.0, %v2158_v57  ;;  %v836_v39 = vmul.f32 %v804_v63, %v708_v11 }
 0x2a7   :  { %2081 = vmatprep.mubr.f32.mxu0 %v833_v56  ;;  %v2162_v23 = vpop.eup %2161  ;;  %v806_v28 = vadd.f32 1.0, %v2160_v47  ;;  %v3017_v56 = vld [vmem:[%s3583_s6] ss:$0 sm:$0xff] }
 0x2a8   :  { %v837_v54 = vmul.f32 %v805_v37, %v709_v9  ;;  %v807_v26 = vadd.f32 1.0, %v2162_v23 }
 0x2a9   :  { %v2164_v44 = vpop.eup %2163  ;;  %v838_v8 = vmul.f32 %v806_v28, %v710_v6 }
 0x2aa   :  { %2082 = vmatmul.mubr.f32.gmra.mxu0 %v834_v21  ;;  %v2166_v50 = vpop.eup %2165  ;;  %v808_v33 = vadd.f32 1.0, %v2164_v44  ;;  %v839_v40 = vmul.f32 %v807_v26, %v711_v29 }
 0x2ab   :  { %2084 = vmatprep.mubr.f32.mxu0 %v835_v30  ;;  %v2168_v46 = vpop.eup %2167  ;;  %v809_v22 = vadd.f32 1.0, %v2166_v50 }
 0x2ac   :  { %v840_v61 = vmul.f32 %v808_v33, %v712_v0  ;;  %v810_v1 = vadd.f32 1.0, %v2168_v46 }
 0x2ad   :  { %v841_v7 = vmul.f32 %v809_v22, %v713_v42 }
 0x2ae   :  { %2085 = vmatmul.mubr.f32.gmra.mxu0 %v836_v39  ;;  %v842_v2 = vmul.f32 %v810_v1, %v714_v17 }
 0x2af   :  { %2087 = vmatprep.mubr.f32.mxu0 %v837_v54 }
 0x2b2   :  { %2088 = vmatmul.mubr.f32.gmra.mxu0 %v838_v8 }
 0x2b3   :  { %2090 = vmatprep.mubr.f32.mxu0 %v839_v40 }
 0x2b6   :  { %2091 = vmatmul.mubr.f32.gmra.mxu0 %v840_v61 }
 0x2b7   :  { %2093 = vmatprep.mubr.f32.mxu0 %v841_v7 }
 0x2ba   :  { %2094 = vmatmul.mubr.f32.gmra.mxu0 %v842_v2 }
 0x33e   :  { %v2996_v60 = vpop.f32.mrf.mxu0 }
 0x33f   :  { %v3141_v2 = vadd.f32 %v2996_v60, %v3017_v56 }
 0x340   :  { %v2998_v43 = vpop.f32.mrf.mxu0 }
 0x342   :  { %v3000_v58 = vpop.f32.mrf.mxu0 }
 0x343   :  { %v3121_v61 = vadd.f32 %v3000_v58, %v3017_v56 }
 0x344   :  { %v3002_v45 = vpop.f32.mrf.mxu0 }
 0x345   :  { %v3131_v7 = vadd.f32 %v3017_v56, %v3002_v45  ;;  %v3151_v45 = vadd.f32 %v3017_v56, %v2998_v43 }
 0x346   :  { %v3004_v36 = vpop.f32.mrf.mxu0 }
 0x347   :  { %v3103_v40 = vadd.f32 %v3004_v36, %v3017_v56 }
 0x348   :  { %v3006_v18 = vpop.f32.mrf.mxu0 }
 0x349   :  { %v3112_v0 = vadd.f32 %v3017_v56, %v3006_v18  ;;  %v3591_v18 = vmov 1.0  }
 0x34a   :  { %v2059_v38 = vpop.f32.mrf.mxu0 }
 0x34b   :  { %v3086_v29 = vadd.f32 %v2059_v38, %v3017_v56 }
 0x34c   :  { %v962_v31 = vpop.f32.mrf.mxu0 }
 0x34d   :  { %v3094_v33 = vadd.f32 %v3017_v56, %v962_v31 }
 0x34e   :  { %v2062_v52 = vpop.f32.mrf.mxu0 }
 0x34f   :  { %v3070_v54 = vadd.f32 %v2062_v52, %v3017_v56 }
 0x350   :  { %v972_v24 = vpop.f32.mrf.mxu0 }
 0x351   :  { %v3078_v50 = vadd.f32 %v3017_v56, %v972_v24 }
 0x352   :  { %v2065_v27 = vpop.f32.mrf.mxu0 }
 0x353   :  { %v3054_v9 = vadd.f32 %v2065_v27, %v3017_v56 }
 0x354   :  { %v982_v15 = vpop.f32.mrf.mxu0 }
 0x355   :  { %v3062_v28 = vadd.f32 %v3017_v56, %v982_v15 }
 0x356   :  { %v2068_v16 = vpop.f32.mrf.mxu0 }
 0x357   :  { %v3038_v30 = vadd.f32 %v2068_v16, %v3017_v56  ;;  %v1172_v16 = vmul.f32 %v3054_v9, %v3054_v9 }
 0x358   :  { %v992_v13 = vpop.f32.mrf.mxu0 }
 0x359   :  { %v3046_v23 = vadd.f32 %v3017_v56, %v992_v13  ;;  %v1174_v52 = vmul.f32 %v3038_v30, %v3038_v30 }
 0x35a   :  { %v2071_v10 = vpop.f32.mrf.mxu0 }
 0x35b   :  { %v3023_v62 = vadd.f32 %v2071_v10, %v3017_v56  ;;  %v1173_v27 = vmul.f32 %v3046_v23, %v3046_v23  ;;  %v1171_v10 = vmul.f32 %v3062_v28, %v3062_v28 }
 0x35c   :  { %v1002_v25 = vpop.f32.mrf.mxu0 }
 0x35d   :  { %v3030_v63 = vadd.f32 %v3017_v56, %v1002_v25  ;;  %v1176_v36 = vmul.f32 %v3023_v62, %v3023_v62 }
 0x35e   :  { %v3008_v19 = vpop.f32.mrf.mxu0 }
 0x35f   :  { %v3136_v17 = vadd.f32 %v3008_v19, %v3017_v56  ;;  %v1175_v43 = vmul.f32 %v3030_v63, %v3030_v63  ;;  %v1170_v19 = vmul.f32 %v3070_v54, %v3070_v54 }
 0x360   :  { %v3010_v14 = vpop.f32.mrf.mxu0 }
 0x361   :  { %v3146_v58 = vadd.f32 %v3017_v56, %v3010_v14 }
 0x362   :  { %v2077_v55 = vpop.f32.mrf.mxu0 }
 0x363   :  { %v3116_v42 = vadd.f32 %v2077_v55, %v3017_v56  ;;  %v1169_v55 = vmul.f32 %v3078_v50, %v3078_v50 }
 0x364   :  { %v3012_v48 = vpop.f32.mrf.mxu0 }
 0x365   :  { %v3126_v1 = vadd.f32 %v3017_v56, %v3012_v48 }
 0x366   :  { %v2080_v34 = vpop.f32.mrf.mxu0 }
 0x367   :  { %v3098_v46 = vadd.f32 %v2080_v34, %v3017_v56  ;;  %v1168_v34 = vmul.f32 %v3086_v29, %v3086_v29 }
 0x368   :  { %v1032_v41 = vpop.f32.mrf.mxu0 }
 0x369   :  { %v3107_v22 = vadd.f32 %v3017_v56, %v1032_v41 }
 0x36a   :  { %v2083_v5 = vpop.f32.mrf.mxu0 }
 0x36b   :  { %v3082_v6 = vadd.f32 %v2083_v5, %v3017_v56  ;;  %v1167_v5 = vmul.f32 %v3094_v33, %v3094_v33 }
 0x36c   :  { %v1042_v12 = vpop.f32.mrf.mxu0 }
 0x36d   :  { %v3090_v8 = vadd.f32 %v3017_v56, %v1042_v12  ;;  %v1184_v48 = vmul.f32 %v3082_v6, %v3082_v6  ;;  %v1182_v12 = vmul.f32 %v3098_v46, %v3098_v46 }
 0x36e   :  { %v2086_v3 = vpop.f32.mrf.mxu0 }
 0x36f   :  { %v3066_v44 = vadd.f32 %v2086_v3, %v3017_v56  ;;  %v1183_v41 = vmul.f32 %v3090_v8, %v3090_v8  ;;  %v1166_v3 = vmul.f32 %v3103_v40, %v3103_v40 }
 0x370   :  { %v1052_v20 = vpop.f32.mrf.mxu0 }
 0x371   :  { %v3074_v26 = vadd.f32 %v3017_v56, %v1052_v20  ;;  %v1186_v25 = vmul.f32 %v3066_v44, %v3066_v44  ;;  %v1181_v20 = vmul.f32 %v3107_v22, %v3107_v22 }
 0x372   :  { %v2089_v4 = vpop.f32.mrf.mxu0 }
 0x373   :  { %v3050_v11 = vadd.f32 %v2089_v4, %v3017_v56  ;;  %v1185_v14 = vmul.f32 %v3074_v26, %v3074_v26  ;;  %v1165_v4 = vmul.f32 %v3112_v0, %v3112_v0 }
 0x374   :  { %v1062_v32 = vpop.f32.mrf.mxu0 }
 0x375   :  { %v3058_v39 = vadd.f32 %v3017_v56, %v1062_v32  ;;  %v1188_v15 = vmul.f32 %v3050_v11, %v3050_v11  ;;  %v1180_v32 = vmul.f32 %v3116_v42, %v3116_v42 }
 0x376   :  { %v2092_v53 = vpop.f32.mrf.mxu0 }
 0x377   :  { %v3034_v47 = vadd.f32 %v2092_v53, %v3017_v56  ;;  %v1187_v13 = vmul.f32 %v3058_v39, %v3058_v39  ;;  %v1164_v53 = vmul.f32 %v3121_v61, %v3121_v61 }
 0x378   :  { %v1072_v35 = vpop.f32.mrf.mxu0 }
 0x379   :  { %v3042_v37 = vadd.f32 %v3017_v56, %v1072_v35  ;;  %v1190_v31 = vmul.f32 %v3034_v47, %v3034_v47  ;;  %v1179_v35 = vmul.f32 %v3126_v1, %v3126_v1 }
 0x37a   :  { %v2095_v51 = vpop.f32.mrf.mxu0 }
 0x37b   :  { %v3020_v57 = vadd.f32 %v2095_v51, %v3017_v56  ;;  %v1189_v24 = vmul.f32 %v3042_v37, %v3042_v37  ;;  %v1178_v51 = vmul.f32 %v3136_v17, %v3136_v17 }
 0x37c   :  { %v1082_v59 = vpop.f32.mrf.mxu0 }
 0x37d   :  { %v3026_v21 = vadd.f32 %v3017_v56, %v1082_v59  ;;  %1866 = vmatprep.subr.mxu1 %v3020_v57  ;;  %v1192_v60 = vmul.f32 %v3020_v57, %v3020_v57  ;;  %v1163_v56 = vmul.f32 %v3131_v7, %v3131_v7  ;;  %v1162_v59 = vmul.f32 %v3141_v2, %v3141_v2 }
 0x37e   :  { %1867 = vmatpush3.msra.mxu1 %v3023_v62 }
 0x37f   :  { %1868 = vmatprep.subr.mxu1 %v3026_v21  ;;  %v1191_v38 = vmul.f32 %v3026_v21, %v3026_v21 }
 0x380   :  { %1869 = vmatpush3.msra.mxu1 %v3030_v63 }
 0x381   :  { %1870 = vmatprep.subr.mxu1 %v3034_v47 }
 0x382   :  { %1871 = vmatpush3.msra.mxu1 %v3038_v30 }
 0x383   :  { %1872 = vmatprep.subr.mxu1 %v3042_v37 }
 0x384   :  { %1873 = vmatpush3.msra.mxu1 %v3046_v23 }
 0x385   :  { %1874 = vmatprep.subr.mxu1 %v3050_v11 }
 0x386   :  { %1875 = vmatpush3.msra.mxu1 %v3054_v9 }
 0x387   :  { %1876 = vmatprep.subr.mxu1 %v3058_v39 }
 0x388   :  { %1877 = vmatpush3.msra.mxu1 %v3062_v28 }
 0x389   :  { %1878 = vmatprep.subr.mxu1 %v3066_v44 }
 0x38a   :  { %1879 = vmatpush3.msra.mxu1 %v3070_v54 }
 0x38b   :  { %1880 = vmatprep.subr.mxu1 %v3074_v26 }
 0x38c   :  { %1881 = vmatpush3.msra.mxu1 %v3078_v50 }
 0x38d   :  { %1882 = vmatprep.subr.mxu1 %v3082_v6 }
 0x38e   :  { %1883 = vmatpush3.msra.mxu1 %v3086_v29 }
 0x38f   :  { %1884 = vmatprep.subr.mxu1 %v3090_v8 }
 0x390   :  { %1885 = vmatpush3.msra.mxu1 %v3094_v33 }
 0x391   :  { %1886 = vmatprep.subr.mxu1 %v3098_v46 }
 0x392   :  { %1887 = vmatpush3.msra.mxu1 %v3103_v40 }
 0x393   :  { %1888 = vmatprep.subr.mxu1 %v3107_v22 }
 0x394   :  { %1889 = vmatpush3.msra.mxu1 %v3112_v0 }
 0x395   :  { %1890 = vmatprep.subr.mxu1 %v3116_v42 }
 0x396   :  { %1891 = vmatpush3.msra.mxu1 %v3121_v61 }
 0x397   :  { %1892 = vmatprep.subr.mxu1 %v3126_v1 }
 0x398   :  { %1893 = vmatpush3.msra.mxu1 %v3131_v7 }
 0x399   :  { %1894 = vmatprep.subr.mxu1 %v3136_v17 }
 0x39a   :  { %1895 = vmatpush3.msra.mxu1 %v3141_v2 }
 0x39b   :  { %1896 = vmatprep.subr.mxu1 %v3146_v58 }
 0x39c   :  { %1897 = vmatpush3.msra.mxu1 %v3151_v45 }
 0x39d   :  { %1156 = vmatmul.mubr.f32.vlgmr.msra.gmra.mxu1 %v3591_v18  ;;  %1901 = vmatprep.subr.mxu1 %v1192_v60  ;;  %v1177_v60 = vmul.f32 %v3146_v58, %v3146_v58 }
 0x39e   :  { %1902 = vmatpush3.msra.mxu1 %v1176_v36  ;;  %1257 = vmatprep.mubr.f32.mxu1 %v3591_v18  ;;  %v1161_v36 = vmul.f32 %v3151_v45, %v3151_v45 }
 0x39f   :  { %1903 = vmatprep.subr.mxu1 %v1191_v38 }
 0x3a0   :  { %1904 = vmatpush3.msra.mxu1 %v1175_v43 }
 0x3a1   :  { %1905 = vmatprep.subr.mxu1 %v1190_v31 }
 0x3a2   :  { %1906 = vmatpush3.msra.mxu1 %v1174_v52 }
 0x3a3   :  { %1907 = vmatprep.subr.mxu1 %v1189_v24 }
 0x3a4   :  { %1908 = vmatpush3.msra.mxu1 %v1173_v27 }
 0x3a5   :  { %1909 = vmatprep.subr.mxu1 %v1188_v15 }
 0x3a6   :  { %1910 = vmatpush3.msra.mxu1 %v1172_v16 }
 0x3a7   :  { %1911 = vmatprep.subr.mxu1 %v1187_v13 }
 0x3a8   :  { %1912 = vmatpush3.msra.mxu1 %v1171_v10 }
 0x3a9   :  { %1913 = vmatprep.subr.mxu1 %v1186_v25 }
 0x3aa   :  { %1914 = vmatpush3.msra.mxu1 %v1170_v19 }
 0x3ab   :  { %1915 = vmatprep.subr.mxu1 %v1185_v14 }
 0x3ac   :  { %1916 = vmatpush3.msra.mxu1 %v1169_v55 }
 0x3ad   :  { %1917 = vmatprep.subr.mxu1 %v1184_v48 }
 0x3ae   :  { %1918 = vmatpush3.msra.mxu1 %v1168_v34 }
 0x3af   :  { %1919 = vmatprep.subr.mxu1 %v1183_v41 }
 0x3b0   :  { %1920 = vmatpush3.msra.mxu1 %v1167_v5 }
 0x3b1   :  { %1921 = vmatprep.subr.mxu1 %v1182_v12 }
 0x3b2   :  { %1922 = vmatpush3.msra.mxu1 %v1166_v3 }
 0x3b3   :  { %1923 = vmatprep.subr.mxu1 %v1181_v20 }
 0x3b4   :  { %1924 = vmatpush3.msra.mxu1 %v1165_v4 }
 0x3b5   :  { %1925 = vmatprep.subr.mxu1 %v1180_v32 }
 0x3b6   :  { %1926 = vmatpush3.msra.mxu1 %v1164_v53 }
 0x3b7   :  { %1927 = vmatprep.subr.mxu1 %v1179_v35 }
 0x3b8   :  { %1928 = vmatpush3.msra.mxu1 %v1163_v56 }
 0x3b9   :  { %1929 = vmatprep.subr.mxu1 %v1178_v51 }
 0x3ba   :  { %1930 = vmatpush3.msra.mxu1 %v1162_v59 }
 0x3bb   :  { %1931 = vmatprep.subr.mxu1 %v1177_v60 }
 0x3bc   :  { %1932 = vmatpush3.msra.mxu1 %v1161_v36 }
 0x3bd   :  { %1258 = vmatmul.mubr.f32.vlgmr.msra.gmra.mxu1 %v3591_v18 }
 0x45d   :  { %v1898_v38 = vpop.f32.mrf.mxu1 }
 0x45f   :  { %v1899_v43 = vpop.f32.mrf.mxu1 }
 0x460   :  { %v1900_v31 = vadd.f32 %v1899_v43, %v1898_v38 }
 0x462   :  { %v1265_v24 = vmul.f32 0.00390625, %v1900_v31 }
 0x464   :  { %v1267_v16 = vmul.f32 %v1265_v24, %v1265_v24  ;;  %v3224_v14 = vrot.slane %v1265_v24, %v2657_v49 }
 0x466   :  { %v1274_v55 = vsub.f32 %v3151_v45, %v3224_v14  ;;  %v1275_v18 = vsub.f32 %v3141_v2, %v3224_v14  ;;  %v1276_v48 = vsub.f32 %v3131_v7, %v3224_v14  ;;  %v1277_v34 = vsub.f32 %v3121_v61, %v3224_v14 }
 0x467   :  { %v1278_v41 = vsub.f32 %v3112_v0, %v3224_v14  ;;  %v1279_v12 = vsub.f32 %v3103_v40, %v3224_v14  ;;  %v1280_v3 = vsub.f32 %v3094_v33, %v3224_v14  ;;  %v1281_v45 = vsub.f32 %v3086_v29, %v3224_v14 }
 0x468   :  { %v1282_v2 = vsub.f32 %v3078_v50, %v3224_v14  ;;  %v1283_v7 = vsub.f32 %v3070_v54, %v3224_v14  ;;  %v1284_v61 = vsub.f32 %v3062_v28, %v3224_v14  ;;  %v1285_v0 = vsub.f32 %v3054_v9, %v3224_v14 }
 0x469   :  { %v1286_v40 = vsub.f32 %v3046_v23, %v3224_v14  ;;  %v1287_v33 = vsub.f32 %v3038_v30, %v3224_v14  ;;  %v1288_v29 = vsub.f32 %v3030_v63, %v3224_v14  ;;  %v1289_v50 = vsub.f32 %v3023_v62, %v3224_v14 }
 0x46a   :  { %v1290_v54 = vsub.f32 %v3146_v58, %v3224_v14  ;;  %v1291_v28 = vsub.f32 %v3136_v17, %v3224_v14  ;;  %v1292_v9 = vsub.f32 %v3126_v1, %v3224_v14  ;;  %v1293_v23 = vsub.f32 %v3116_v42, %v3224_v14 }
 0x46b   :  { %v1294_v63 = vsub.f32 %v3107_v22, %v3224_v14  ;;  %v1295_v62 = vsub.f32 %v3098_v46, %v3224_v14  ;;  %v1296_v58 = vsub.f32 %v3090_v8, %v3224_v14  ;;  %v1297_v17 = vsub.f32 %v3082_v6, %v3224_v14 }
 0x46c   :  { %v1298_v1 = vsub.f32 %v3074_v26, %v3224_v14  ;;  %v1299_v42 = vsub.f32 %v3066_v44, %v3224_v14  ;;  %v1301_v22 = vsub.f32 %v3050_v11, %v3224_v14  ;;  %v1302_v46 = vsub.f32 %v3042_v37, %v3224_v14 }
 0x46d   :  { %v1303_v8 = vsub.f32 %v3034_v47, %v3224_v14  ;;  %v1304_v6 = vsub.f32 %v3026_v21, %v3224_v14  ;;  %v1305_v26 = vsub.f32 %v3020_v57, %v3224_v14 }
 0x47d   :  { %v1933_v52 = vpop.f32.mrf.mxu1 }
 0x47f   :  { %v1934_v27 = vpop.f32.mrf.mxu1 }
 0x480   :  { %v1935_v15 = vadd.f32 %v1934_v27, %v1933_v52  ;;  %v1698_v52 = vld [vmem:[%s3584_s7] ss:$0 sm:$0xff] }
 0x482   :  { %v1266_v13 = vmul.f32 0.00390625, %v1935_v15 }
 0x484   :  { %v1268_v10 = vsub.f32 %v1266_v13, %v1267_v16 }
 0x486   :  { %v1269_v25 = vmax.f32 %v1268_v10, 0.0 }
 0x488   :  { %v1306_v19 = vadd.f32 1e-05, %v1269_v25 }
 0x48a   :  { %2169 = vrsqrt.f32 %v1306_v19 }
 0x497   :  { %v2170_v5 = vpop.eup %2169 }
 0x498   :  { %v1311_v30 = vrot.slane %v2170_v5, %v2657_v49  ;;  %v1300_v49 = vsub.f32 %v3058_v39, %v3224_v14 }
 0x49a   :  { %v1312_v20 = vmul.f32 %v1311_v30, %v1274_v55  ;;  %v1313_v44 = vmul.f32 %v1311_v30, %v1275_v18  ;;  %v1314_v4 = vmul.f32 %v1311_v30, %v1276_v48  ;;  %v1315_v32 = vmul.f32 %v1311_v30, %v1277_v34 }
 0x49b   :  { %v1316_v39 = vmul.f32 %v1311_v30, %v1278_v41  ;;  %v1317_v53 = vmul.f32 %v1311_v30, %v1279_v12  ;;  %v1318_v35 = vmul.f32 %v1311_v30, %v1280_v3  ;;  %v1319_v11 = vmul.f32 %v1311_v30, %v1281_v45 }
 0x49c   :  { %v1320_v56 = vmul.f32 %v1311_v30, %v1282_v2  ;;  %v1321_v51 = vmul.f32 %v1311_v30, %v1283_v7  ;;  %v1322_v37 = vmul.f32 %v1311_v30, %v1284_v61  ;;  %v1323_v59 = vmul.f32 %v1311_v30, %v1285_v0 }
 0x49d   :  { %v1324_v60 = vmul.f32 %v1311_v30, %v1286_v40  ;;  %v1325_v47 = vmul.f32 %v1311_v30, %v1287_v33  ;;  %v1326_v36 = vmul.f32 %v1311_v30, %v1288_v29  ;;  %v1327_v38 = vmul.f32 %v1311_v30, %v1289_v50 }
 0x49e   :  { %v1328_v21 = vmul.f32 %v1311_v30, %v1290_v54  ;;  %v1329_v43 = vmul.f32 %v1311_v30, %v1291_v28  ;;  %v1330_v31 = vmul.f32 %v1311_v30, %v1292_v9  ;;  %v1331_v57 = vmul.f32 %v1311_v30, %v1293_v23 }
 0x49f   :  { %v1332_v24 = vmul.f32 %v1311_v30, %v1294_v63  ;;  %v1333_v27 = vmul.f32 %v1311_v30, %v1295_v62  ;;  %v1334_v15 = vmul.f32 %v1311_v30, %v1296_v58  ;;  %v1335_v16 = vmul.f32 %v1311_v30, %v1297_v17  ;;  %v1699_v62 = vld [vmem:[%s3585_s8] ss:$0 sm:$0xff]  ;;  %s2359_s8 = smov [#allocation8]  }
 0x4a0   :  { %v1336_v13 = vmul.f32 %v1311_v30, %v1298_v1  ;;  %v1337_v10 = vmul.f32 %v1311_v30, %v1299_v42  ;;  %v1338_v25 = vmul.f32 %v1311_v30, %v1300_v49  ;;  %v1339_v19 = vmul.f32 %v1311_v30, %v1301_v22  ;;  %s3564_s30 = sshll.u32 %s2359_s8, 4  ;;  %s1682_s30 = int_to_ptr.vmem [resolvable:$true] %s3564_s30 }
 0x4a1   :  { %v1340_v14 = vmul.f32 %v1311_v30, %v1302_v46  ;;  %v1341_v55 = vmul.f32 %v1311_v30, %v1303_v8  ;;  %v1342_v18 = vmul.f32 %v1311_v30, %v1304_v6  ;;  %v1343_v48 = vmul.f32 %v1311_v30, %v1305_v26  ;;  %s2327_s10 = scalar_lea.vmem %s1682_s30, 4096  ;;  %p2332_p2 = scmp.lt.s32.totalorder %s1682_s30, %s1682_s30 }
 0x4a2   :  { %v1350_v34 = vmul.f32 %v1698_v52, %v1312_v20  ;;  %v1351_v41 = vmul.f32 %v1698_v52, %v1313_v44  ;;  %v1352_v5 = vmul.f32 %v1698_v52, %v1314_v4  ;;  %v1353_v12 = vmul.f32 %v1698_v52, %v1315_v32  ;;  %p2328_p1 = scmp.ne.s32.totalorder %s1682_s30, %s2327_s10  ;;  %p2333_p3 = scmp.lt.s32.totalorder %s2327_s10, %s2327_s10 }
 0x4a3   :  { %v1354_v3 = vmul.f32 %v1698_v52, %v1316_v39  ;;  %v1355_v45 = vmul.f32 %v1698_v52, %v1317_v53  ;;  %v1356_v2 = vmul.f32 %v1698_v52, %v1318_v35  ;;  %v1357_v7 = vmul.f32 %v1698_v52, %v1319_v11 }
 0x4a4   :  { %v1358_v61 = vmul.f32 %v1698_v52, %v1320_v56  ;;  %v1359_v0 = vmul.f32 %v1698_v52, %v1321_v51  ;;  %v1360_v40 = vmul.f32 %v1698_v52, %v1322_v37  ;;  %v1361_v33 = vmul.f32 %v1698_v52, %v1323_v59  ;;  %p2334_p4 = por %p2333_p3, %p2332_p2 }
 0x4a5   :  { %v1362_v29 = vmul.f32 %v1698_v52, %v1324_v60  ;;  %v1363_v50 = vmul.f32 %v1698_v52, %v1325_v47  ;;  %v1364_v54 = vmul.f32 %v1698_v52, %v1326_v36  ;;  %v1365_v28 = vmul.f32 %v1698_v52, %v1327_v38 }
 0x4a6   :  { %v1366_v9 = vmul.f32 %v1698_v52, %v1328_v21  ;;  %v1367_v23 = vmul.f32 %v1698_v52, %v1329_v43  ;;  %v1368_v63 = vmul.f32 %v1698_v52, %v1330_v31  ;;  %v1369_v30 = vmul.f32 %v1698_v52, %v1331_v57  ;;  %p2335_p5 = pnand %p2334_p4, %p2328_p1 }
 0x4a7   :  { %v1370_v58 = vmul.f32 %v1698_v52, %v1332_v24  ;;  %v1371_v17 = vmul.f32 %v1698_v52, %v1333_v27  ;;  %v1372_v1 = vmul.f32 %v1698_v52, %v1334_v15  ;;  %v1373_v42 = vmul.f32 %v1698_v52, %v1335_v16 }
 0x4a8   :  { %v1374_v49 = vmul.f32 %v1698_v52, %v1336_v13  ;;  %v1375_v22 = vmul.f32 %v1698_v52, %v1337_v10  ;;  %v1376_v46 = vmul.f32 %v1698_v52, %v1338_v25  ;;  %v1377_v8 = vmul.f32 %v1698_v52, %v1339_v19 }
 0x4a9   :  { %v1378_v6 = vmul.f32 %v1698_v52, %v1340_v14  ;;  %v1379_v26 = vmul.f32 %v1698_v52, %v1341_v55  ;;  %v1380_v20 = vmul.f32 %v1698_v52, %v1342_v18  ;;  %v1381_v44 = vmul.f32 %v1698_v52, %v1343_v48 }
 0x4aa   :  { %v1388_v4 = vadd.f32 %v1699_v62, %v1350_v34  ;;  %v1389_v32 = vadd.f32 %v1699_v62, %v1351_v41  ;;  %v1390_v39 = vadd.f32 %v1699_v62, %v1352_v5  ;;  %v1391_v53 = vadd.f32 %v1699_v62, %v1353_v12 }
 0x4ab   :  { %v1392_v35 = vadd.f32 %v1699_v62, %v1354_v3  ;;  %v1393_v11 = vadd.f32 %v1699_v62, %v1355_v45  ;;  %v1394_v56 = vadd.f32 %v1699_v62, %v1356_v2  ;;  %v1395_v51 = vadd.f32 %v1699_v62, %v1357_v7 }
 0x4ac   :  { %v1396_v37 = vadd.f32 %v1699_v62, %v1358_v61  ;;  %v1397_v59 = vadd.f32 %v1699_v62, %v1359_v0  ;;  %v3297_v60 = vadd.f32 %v1699_v62, %v1360_v40  ;;  %v3299_v47 = vadd.f32 %v1699_v62, %v1361_v33 }
 0x4ad   :  { %v3301_v36 = vadd.f32 %v1699_v62, %v1362_v29  ;;  %v3303_v38 = vadd.f32 %v1699_v62, %v1363_v50  ;;  %v3305_v21 = vadd.f32 %v1699_v62, %v1364_v54  ;;  %v3307_v43 = vadd.f32 %v1699_v62, %v1365_v28 }
 0x4ae   :  { %v3309_v31 = vadd.f32 %v1699_v62, %v1366_v9  ;;  %v3311_v57 = vadd.f32 %v1699_v62, %v1367_v23  ;;  %v3313_v52 = vadd.f32 %v1699_v62, %v1368_v63  ;;  %v3315_v24 = vadd.f32 %v1699_v62, %v1369_v30 }
 0x4af   :  { %v3317_v27 = vadd.f32 %v1699_v62, %v1370_v58  ;;  %v3319_v15 = vadd.f32 %v1699_v62, %v1371_v17  ;;  %v3321_v16 = vadd.f32 %v1699_v62, %v1372_v1  ;;  %v3323_v13 = vadd.f32 %v1699_v62, %v1373_v42 }
 0x4b0   :  { %v3325_v10 = vadd.f32 %v1699_v62, %v1374_v49  ;;  %v3327_v25 = vadd.f32 %v1699_v62, %v1375_v22  ;;  %v3329_v19 = vadd.f32 %v1699_v62, %v1376_v46  ;;  %v3331_v14 = vadd.f32 %v1699_v62, %v1377_v8 }
 0x4b1   :  { %v3333_v55 = vadd.f32 %v1699_v62, %v1378_v6  ;;  %v3335_v18 = vadd.f32 %v1699_v62, %v1379_v26  ;;  %v3337_v48 = vadd.f32 %v1699_v62, %v1380_v20  ;;  %v3339_v34 = vmul.f32 0.5, %v1388_v4 }
 0x4b2   :  { %v3341_v41 = vmul.f32 0.5, %v1389_v32  ;;  %v3343_v5 = vmul.f32 0.5, %v1390_v39  ;;  %v3345_v12 = vmul.f32 0.5, %v1391_v53  ;;  %v3347_v3 = vmul.f32 0.5, %v1392_v35 }
 0x4b3   :  { %v3349_v45 = vmul.f32 0.5, %v1393_v11  ;;  %v3351_v2 = vmul.f32 0.5, %v1394_v56  ;;  %v3353_v7 = vmul.f32 0.5, %v1395_v51  ;;  %v3355_v61 = vmul.f32 0.5, %v1396_v37 }
 0x4b4   :  { %v3357_v0 = vadd.f32 %v1699_v62, %v1381_v44  ;;  %v1452_v40 = vmul.f32 0.70710677, %v1388_v4  ;;  %v1453_v33 = vmul.f32 0.70710677, %v1389_v32  ;;  %v1454_v29 = vmul.f32 0.70710677, %v1390_v39 }
 0x4b5   :  { %v3359_v50 = vmul.f32 0.5, %v1397_v59  ;;  %v3362_v54 = vmul.f32 0.5, %v3297_v60  ;;  %v3365_v28 = vmul.f32 0.5, %v3299_v47  ;;  %v1455_v9 = vmul.f32 0.70710677, %v1391_v53 }
 0x4b6   :  { %v3368_v23 = vmul.f32 0.5, %v3301_v36  ;;  %v3371_v63 = vmul.f32 0.5, %v3303_v38  ;;  %v1456_v30 = vmul.f32 0.70710677, %v1392_v35  ;;  %2171 = verf.f32 %v1452_v40 }
 0x4b7   :  { %v3374_v62 = vmul.f32 0.5, %v3305_v21  ;;  %v3377_v58 = vmul.f32 0.5, %v3307_v43  ;;  %v1457_v17 = vmul.f32 0.70710677, %v1393_v11  ;;  %2173 = verf.f32 %v1453_v33 }
 0x4b8   :  { %v3380_v1 = vmul.f32 0.5, %v3309_v31  ;;  %v3383_v42 = vmul.f32 0.5, %v3311_v57  ;;  %v1458_v49 = vmul.f32 0.70710677, %v1394_v56  ;;  %2175 = verf.f32 %v1454_v29 }
 0x4b9   :  { %v3386_v22 = vmul.f32 0.5, %v3313_v52  ;;  %v3389_v46 = vmul.f32 0.5, %v3315_v24  ;;  %v1459_v8 = vmul.f32 0.70710677, %v1395_v51  ;;  %2177 = verf.f32 %v1455_v9 }
 0x4ba   :  { %v3392_v6 = vmul.f32 0.5, %v3317_v27  ;;  %v3395_v26 = vmul.f32 0.5, %v3319_v15  ;;  %v1460_v20 = vmul.f32 0.70710677, %v1396_v37  ;;  %2179 = verf.f32 %v1456_v30 }
 0x4bb   :  { %v3398_v44 = vmul.f32 0.5, %v3321_v16  ;;  %v3401_v4 = vmul.f32 0.5, %v3323_v13  ;;  %v1461_v32 = vmul.f32 0.70710677, %v1397_v59  ;;  %2181 = verf.f32 %v1457_v17 }
 0x4bc   :  { %v3404_v39 = vmul.f32 0.5, %v3325_v10  ;;  %v3407_v53 = vmul.f32 0.5, %v3327_v25  ;;  %v1462_v35 = vmul.f32 0.70710677, %v3297_v60  ;;  %2183 = verf.f32 %v1458_v49 }
 0x4bd   :  { %v3411_v11 = vmul.f32 0.5, %v3329_v19  ;;  %v3414_v56 = vmul.f32 0.5, %v3331_v14  ;;  %v1463_v51 = vmul.f32 0.70710677, %v3299_v47  ;;  %2185 = verf.f32 %v1459_v8 }
 0x4be   :  { %v3418_v37 = vmul.f32 0.5, %v3333_v55  ;;  %v3421_v59 = vmul.f32 0.5, %v3335_v18  ;;  %v1464_v40 = vmul.f32 0.70710677, %v3301_v36  ;;  %2187 = verf.f32 %v1460_v20 }
 0x4bf   :  { %v3425_v60 = vmul.f32 0.5, %v3337_v48  ;;  %v3428_v33 = vmul.f32 0.5, %v3357_v0  ;;  %v1465_v29 = vmul.f32 0.70710677, %v3303_v38  ;;  %2189 = verf.f32 %v1461_v32 }
 0x4c0   :  { %v1466_v47 = vmul.f32 0.70710677, %v3305_v21  ;;  %v1467_v9 = vmul.f32 0.70710677, %v3307_v43  ;;  %v1468_v30 = vmul.f32 0.70710677, %v3309_v31  ;;  %2191 = verf.f32 %v1462_v35 }
 0x4c1   :  { %v1469_v17 = vmul.f32 0.70710677, %v3311_v57  ;;  %v1470_v36 = vmul.f32 0.70710677, %v3313_v52  ;;  %v1471_v49 = vmul.f32 0.70710677, %v3315_v24  ;;  %2193 = verf.f32 %v1463_v51 }
 0x4c2   :  { %v1472_v8 = vmul.f32 0.70710677, %v3317_v27  ;;  %v1473_v20 = vmul.f32 0.70710677, %v3319_v15  ;;  %v1474_v38 = vmul.f32 0.70710677, %v3321_v16  ;;  %2195 = verf.f32 %v1464_v40 }
 0x4c3   :  { %v2172_v21 = vpop.eup %2171  ;;  %v1475_v43 = vmul.f32 0.70710677, %v3323_v13  ;;  %v1476_v31 = vmul.f32 0.70710677, %v3325_v10  ;;  %v3443_v32 = vmul.f32 0.70710677, %v3327_v25  ;;  %2197 = verf.f32 %v1465_v29 }
 0x4c4   :  { %v2174_v57 = vpop.eup %2173  ;;  %v3446_v52 = vmul.f32 0.70710677, %v3329_v19  ;;  %v3449_v24 = vmul.f32 0.70710677, %v3331_v14  ;;  %2199 = verf.f32 %v1466_v47  ;;  %v1516_v27 = vadd.f32 1.0, %v2172_v21  ;;  %v2235_v21 = vld [vmem:[#allocation2] sm:$0xff] }
 0x4c5   :  { %v2176_v15 = vpop.eup %2175  ;;  %v3452_v16 = vmul.f32 0.70710677, %v3333_v55  ;;  %v3455_v13 = vmul.f32 0.70710677, %v3335_v18  ;;  %2201 = verf.f32 %v1467_v9  ;;  %v1517_v10 = vadd.f32 1.0, %v2174_v57 }
 0x4c6   :  { %v2178_v25 = vpop.eup %2177  ;;  %v3458_v35 = vmul.f32 0.70710677, %v3337_v48  ;;  %2203 = verf.f32 %v1468_v30  ;;  %v1518_v19 = vadd.f32 1.0, %v2176_v15  ;;  %v1548_v14 = vmul.f32 %v1516_v27, %v3339_v34  ;;  %v2236_v27 = vld [vmem:[#allocation2 + $0x8] sm:$0xff] }
 0x4c7   :  { %v2180_v51 = vpop.eup %2179  ;;  %v3462_v40 = vmul.f32 0.70710677, %v3357_v0  ;;  %2205 = verf.f32 %v1469_v17  ;;  %v1519_v55 = vadd.f32 1.0, %v2178_v25  ;;  %v1549_v29 = vmul.f32 %v1517_v10, %v3341_v41 }
 0x4c8   :  { %v2182_v18 = vpop.eup %2181  ;;  %2207 = verf.f32 %v1470_v36  ;;  %v1520_v47 = vadd.f32 1.0, %v2180_v51  ;;  %v1550_v9 = vmul.f32 %v1518_v19, %v3343_v5  ;;  %v3466_v48 = vadd.f32 %v2235_v21, %v1548_v14  ;;  %v2237_v36 = vld [vmem:[#allocation2 + $0x10] sm:$0xff] }
 0x4c9   :  { %v2184_v30 = vpop.eup %2183  ;;  %2209 = verf.f32 %v1471_v49  ;;  %v1521_v57 = vadd.f32 1.0, %v2182_v18  ;;  %v1551_v34 = vmul.f32 %v1519_v55, %v3345_v12  ;;  %v3469_v0 = vadd.f32 %v2236_v27, %v1549_v29  ;;  %v2238_v49 = vld [vmem:[#allocation2 + $0x18] sm:$0xff] }
 0x4ca   :  { %v2186_v17 = vpop.eup %2185  ;;  %2211 = verf.f32 %v1472_v8  ;;  %v1522_v15 = vadd.f32 1.0, %v2184_v30  ;;  %v1552_v41 = vmul.f32 %v1520_v47, %v3347_v3  ;;  %v3472_v10 = vadd.f32 %v2237_v36, %v1550_v9  ;;  %v2239_v8 = vld [vmem:[#allocation2 + $0x20] sm:$0xff]  ;;  %v2242_v27 = vld [vmem:[#allocation2 + $0x38] sm:$0xff] }
 0x4cb   :  { %v2188_v5 = vpop.eup %2187  ;;  %2213 = verf.f32 %v1473_v20  ;;  %v1523_v25 = vadd.f32 1.0, %v2186_v17  ;;  %v1553_v19 = vmul.f32 %v1521_v57, %v3349_v45  ;;  %v3475_v14 = vadd.f32 %v2238_v49, %v1551_v34  ;;  %v2240_v20 = vld [vmem:[#allocation2 + $0x28] sm:$0xff] }
 0x4cc   :  { %v2190_v12 = vpop.eup %2189  ;;  %2215 = verf.f32 %v1474_v38  ;;  %v1524_v51 = vadd.f32 1.0, %v2188_v5  ;;  %v1554_v55 = vmul.f32 %v1522_v15, %v3351_v2  ;;  %v3478_v29 = vadd.f32 %v2239_v8, %v1552_v41  ;;  %v2241_v38 = vld [vmem:[#allocation2 + $0x30] sm:$0xff]  ;;  %v2243_v41 = vld [vmem:[#allocation2 + $0x40] sm:$0xff]  ;;  %v2246_v8 = vld [vmem:[#allocation2 + $0x58] sm:$0xff] }
 0x4cd   :  { %v2192_v3 = vpop.eup %2191  ;;  %2217 = verf.f32 %v1475_v43  ;;  %v1525_v18 = vadd.f32 1.0, %v2190_v12  ;;  %v1555_v47 = vmul.f32 %v1523_v25, %v3353_v7  ;;  %v3481_v9 = vadd.f32 %v2240_v20, %v1553_v19  ;;  %v2244_v25 = vld [vmem:[#allocation2 + $0x48] sm:$0xff]  ;;  %v2245_v12 = vld [vmem:[#allocation2 + $0x50] sm:$0xff] }
 0x4ce   :  { %v2194_v45 = vpop.eup %2193  ;;  %2219 = verf.f32 %v1476_v31  ;;  %v1526_v21 = vadd.f32 1.0, %v2192_v3  ;;  %v1556_v30 = vmul.f32 %v1524_v51, %v3355_v61  ;;  %v3484_v57 = vadd.f32 %v2241_v38, %v1554_v55 }
 0x4cf   :  { %v2196_v2 = vpop.eup %2195  ;;  %2221 = verf.f32 %v3443_v32  ;;  %v1527_v34 = vadd.f32 1.0, %v2194_v45  ;;  %v1557_v43 = vmul.f32 %v1525_v18, %v3359_v50  ;;  %v3488_v17 = vadd.f32 %v2242_v27, %v1555_v47  ;;  %v2247_v47 = vld [vmem:[#allocation2 + $0x60] sm:$0xff] }
 0x4d0   :  { %v2198_v7 = vpop.eup %2197  ;;  %2223 = verf.f32 %v3446_v52  ;;  %v1528_v15 = vadd.f32 1.0, %v2196_v2  ;;  %v1558_v31 = vmul.f32 %v1526_v21, %v3362_v54  ;;  %v3492_v61 = vadd.f32 %v2243_v41, %v1556_v30  ;;  %v2248_v21 = vld [vmem:[#allocation2 + $0x68] sm:$0xff] }
 0x4d1   :  { %v2200_v36 = vpop.eup %2199  ;;  %2225 = verf.f32 %v3449_v24  ;;  %v1529_v5 = vadd.f32 1.0, %v2198_v7  ;;  %v1559_v32 = vmul.f32 %v1527_v34, %v3365_v28  ;;  %v3496_v50 = vadd.f32 %v2244_v25, %v1557_v43 }
 0x4d2   :  { %v2202_v19 = vpop.eup %2201  ;;  %2227 = verf.f32 %v3452_v16  ;;  %v1530_v49 = vadd.f32 1.0, %v2200_v36  ;;  %v1560_v52 = vmul.f32 %v1528_v15, %v3368_v23  ;;  %v3500_v54 = vadd.f32 %v2245_v12, %v1558_v31 }
 0x4d3   :  { %v2204_v51 = vpop.eup %2203  ;;  %2229 = verf.f32 %v3455_v13  ;;  %v1531_v55 = vadd.f32 1.0, %v2202_v19  ;;  %v1561_v24 = vmul.f32 %v1529_v5, %v3371_v63  ;;  %v3504_v28 = vadd.f32 %v2246_v8, %v1559_v32  ;;  %v2251_v5 = vld [vmem:[#allocation2 + $0x80] sm:$0xff] }
 0x4d4   :  { %v2206_v3 = vpop.eup %2205  ;;  %2231 = verf.f32 %v3458_v35  ;;  %v1532_v18 = vadd.f32 1.0, %v2204_v51  ;;  %v1562_v16 = vmul.f32 %v1530_v49, %v3374_v62  ;;  %v3508_v23 = vadd.f32 %v2247_v47, %v1560_v52  ;;  %v2249_v35 = vld [vmem:[#allocation2 + $0x70] sm:$0xff] }
 0x4d5   :  { %v2208_v20 = vpop.eup %2207  ;;  %2233 = verf.f32 %v3462_v40  ;;  %v1533_v45 = vadd.f32 1.0, %v2206_v3  ;;  %v1563_v13 = vmul.f32 %v1531_v55, %v3377_v58  ;;  %v3512_v63 = vadd.f32 %v2248_v21, %v1561_v24  ;;  %v2250_v40 = vld [vmem:[#allocation2 + $0x78] sm:$0xff]  ;;  %v2253_v51 = vld [vmem:[#allocation2 + $0x90] sm:$0xff] }
 0x4d6   :  { %v2210_v30 = vpop.eup %2209  ;;  %v1534_v38 = vadd.f32 1.0, %v2208_v20  ;;  %v1564_v2 = vmul.f32 %v1532_v18, %v3380_v1  ;;  %v3515_v34 = vadd.f32 %v2249_v35, %v1562_v16  ;;  %v1612_v62 = vmul.f32 0.7072136, %v3466_v48  ;;  %v2254_v3 = vld [vmem:[#allocation2 + $0x98] sm:$0xff]  ;;  %v2255_v20 = vld [vmem:[#allocation2 + $0xa0] sm:$0xff] }
 0x4d7   :  { %v2212_v43 = vpop.eup %2211  ;;  %v1535_v27 = vadd.f32 1.0, %v2210_v30  ;;  %v1565_v7 = vmul.f32 %v1533_v45, %v3383_v42  ;;  %v3519_v15 = vadd.f32 %v2250_v40, %v1563_v13  ;;  %v1613_v58 = vmul.f32 0.7072136, %v3469_v0  ;;  %v2252_v42 = vld [vmem:[#allocation2 + $0x88] sm:$0xff] }
 0x4d8   :  { %v2214_v31 = vpop.eup %2213  ;;  %v1536_v41 = vadd.f32 1.0, %v2212_v43  ;;  %v1566_v36 = vmul.f32 %v1534_v38, %v3386_v22  ;;  %v3523_v1 = vadd.f32 %v2251_v5, %v1564_v2  ;;  %v1614_v32 = vmul.f32 0.7072136, %v3472_v10  ;;  %1644 = vst [vmem:[#allocation8] sm:$0xff] %v1612_v62  ;;  %v2256_v30 = vld [vmem:[#allocation2 + $0xa8] sm:$0xff]  ;;  %v2257_v62 = vld [vmem:[#allocation2 + $0xb0] sm:$0xff] }
 0x4d9   :  { %v2216_v48 = vpop.eup %2215  ;;  %v1537_v25 = vadd.f32 1.0, %v2214_v31  ;;  %v1567_v19 = vmul.f32 %v1535_v27, %v3389_v46  ;;  %v3527_v49 = vadd.f32 %v2252_v42, %v1565_v7  ;;  %v1615_v52 = vmul.f32 0.7072136, %v3475_v14  ;;  %1645 = vst [vmem:[#allocation8 + $0x8] sm:$0xff] %v1613_v58  ;;  %v2259_v5 = vld [vmem:[#allocation2 + $0xc0] sm:$0xff] }
 0x4da   :  { %v2218_v0 = vpop.eup %2217  ;;  %v1538_v12 = vadd.f32 1.0, %v2216_v48  ;;  %v1568_v22 = vmul.f32 %v1536_v41, %v3392_v6  ;;  %v3531_v55 = vadd.f32 %v2253_v51, %v1566_v36  ;;  %v1616_v10 = vmul.f32 0.7072136, %v3478_v29  ;;  %1646 = vst [vmem:[#allocation8 + $0x10] sm:$0xff] %v1614_v32 }
 0x4db   :  { %v2220_v24 = vpop.eup %2219  ;;  %v1539_v8 = vadd.f32 1.0, %v2218_v0  ;;  %v1569_v46 = vmul.f32 %v1537_v25, %v3395_v26  ;;  %v3535_v18 = vadd.f32 %v2254_v3, %v1567_v19  ;;  %v1617_v14 = vmul.f32 0.7072136, %v3481_v9  ;;  %1647 = vst [vmem:[#allocation8 + $0x18] sm:$0xff] %v1615_v52  ;;  %v2260_v19 = vld [vmem:[#allocation2 + $0xc8] sm:$0xff] }
 0x4dc   :  { %v2222_v16 = vpop.eup %2221  ;;  %v1540_v47 = vadd.f32 1.0, %v2220_v24  ;;  %v1570_v6 = vmul.f32 %v1538_v12, %v3398_v44  ;;  %v3539_v45 = vadd.f32 %v2255_v20, %v1568_v22  ;;  %v1618_v29 = vmul.f32 0.7072136, %v3484_v57  ;;  %1648 = vst [vmem:[#allocation8 + $0x20] sm:$0xff] %v1616_v10  ;;  %v2261_v12 = vld [vmem:[#allocation2 + $0xd0] sm:$0xff]  ;;  %v2262_v10 = vld [vmem:[#allocation2 + $0xd8] sm:$0xff] }
 0x4dd   :  { %v2224_v13 = vpop.eup %2223  ;;  %v1541_v21 = vadd.f32 1.0, %v2222_v16  ;;  %v1571_v26 = vmul.f32 %v1539_v8, %v3401_v4  ;;  %v3543_v38 = vadd.f32 %v2256_v30, %v1569_v46  ;;  %v1619_v9 = vmul.f32 0.7072136, %v3488_v17  ;;  %1649 = vst [vmem:[#allocation8 + $0x28] sm:$0xff] %v1617_v14  ;;  %v2258_v4 = vld [vmem:[#allocation2 + $0xb8] sm:$0xff]  ;;  %v2263_v8 = vld [vmem:[#allocation2 + $0xe0] sm:$0xff] }
 0x4de   :  { %v2226_v2 = vpop.eup %2225  ;;  %v1542_v35 = vadd.f32 1.0, %v2224_v13  ;;  %v1572_v44 = vmul.f32 %v1540_v47, %v3404_v39  ;;  %v1602_v43 = vadd.f32 %v2257_v62, %v1570_v6  ;;  %v1620_v27 = vmul.f32 0.7072136, %v3492_v61  ;;  %1650 = vst [vmem:[#allocation8 + $0x30] sm:$0xff] %v1618_v29  ;;  %v2264_v14 = vld [vmem:[#allocation2 + $0xe8] sm:$0xff] }
 0x4df   :  { %v2228_v57 = vpop.eup %2227  ;;  %v1543_v7 = vadd.f32 1.0, %v2226_v2  ;;  %v1573_v40 = vmul.f32 %v1541_v21, %v3407_v53  ;;  %v1603_v58 = vadd.f32 %v2258_v4, %v1571_v26  ;;  %v1621_v31 = vmul.f32 0.7072136, %v3496_v50  ;;  %1651 = vst [vmem:[#allocation8 + $0x38] sm:$0xff] %v1619_v9 }
 0x4e0   :  { %v2230_v17 = vpop.eup %2229  ;;  %v1544_v41 = vadd.f32 1.0, %v2228_v57  ;;  %v1574_v36 = vmul.f32 %v1542_v35, %v3411_v11  ;;  %v1604_v39 = vadd.f32 %v2259_v5, %v1572_v44  ;;  %v1622_v32 = vmul.f32 0.7072136, %v3500_v54  ;;  %1652 = vst [vmem:[#allocation8 + $0x40] sm:$0xff] %v1620_v27 }
 0x4e1   :  { %v2232_v61 = vpop.eup %2231  ;;  %v1545_v48 = vadd.f32 1.0, %v2230_v17  ;;  %v1575_v25 = vmul.f32 %v1543_v7, %v3414_v56  ;;  %v1605_v53 = vadd.f32 %v2260_v19, %v1573_v40  ;;  %v1623_v42 = vmul.f32 0.7072136, %v3504_v28  ;;  %1653 = vst [vmem:[#allocation8 + $0x48] sm:$0xff] %v1621_v31 }
 0x4e2   :  { %v2234_v50 = vpop.eup %2233  ;;  %v1546_v52 = vadd.f32 1.0, %v2232_v61  ;;  %v1576_v0 = vmul.f32 %v1544_v41, %v3418_v37  ;;  %v1606_v11 = vadd.f32 %v2261_v12, %v1574_v36  ;;  %v1624_v22 = vmul.f32 0.7072136, %v3508_v23  ;;  %1654 = vst [vmem:[#allocation8 + $0x50] sm:$0xff] %v1622_v32 }
 0x4e3   :  { %v1547_v54 = vadd.f32 1.0, %v2234_v50  ;;  %v1577_v51 = vmul.f32 %v1545_v48, %v3421_v59  ;;  %v1607_v24 = vadd.f32 %v2262_v10, %v1575_v25  ;;  %v1625_v56 = vmul.f32 0.7072136, %v3512_v63  ;;  %1655 = vst [vmem:[#allocation8 + $0x58] sm:$0xff] %v1623_v42 }
 0x4e4   :  { %v1578_v28 = vmul.f32 %v1546_v52, %v3425_v60  ;;  %v1608_v46 = vadd.f32 %v2263_v8, %v1576_v0  ;;  %v1626_v3 = vmul.f32 0.7072136, %v3515_v34  ;;  %v1627_v37 = vmul.f32 0.7072136, %v3519_v15  ;;  %1656 = vst [vmem:[#allocation8 + $0x60] sm:$0xff] %v1624_v22  ;;  %v2265_v60 = vld [vmem:[#allocation2 + $0xf0] sm:$0xff] }
 0x4e5   :  { %v1579_v23 = vmul.f32 %v1547_v54, %v3428_v33  ;;  %v1609_v16 = vadd.f32 %v2264_v14, %v1577_v51  ;;  %v1628_v59 = vmul.f32 0.7072136, %v3523_v1  ;;  %v1629_v47 = vmul.f32 0.7072136, %v3527_v49  ;;  %1657 = vst [vmem:[#allocation8 + $0x68] sm:$0xff] %v1625_v56  ;;  %v2266_v33 = vld [vmem:[#allocation2 + $0xf8] sm:$0xff] }
 0x4e6   :  { %v1610_v63 = vadd.f32 %v2265_v60, %v1578_v28  ;;  %v1630_v6 = vmul.f32 0.7072136, %v3531_v55  ;;  %v1631_v34 = vmul.f32 0.7072136, %v3535_v18  ;;  %v1632_v15 = vmul.f32 0.7072136, %v3539_v45 }
 0x4e7   :  { %1658 = vst [vmem:[#allocation8 + $0x70] sm:$0xff] %v1626_v3  ;;  %1659 = vst [vmem:[#allocation8 + $0x78] sm:$0xff] %v1627_v37  ;;  %v1611_v20 = vadd.f32 %v2266_v33, %v1579_v23  ;;  %v1633_v1 = vmul.f32 0.7072136, %v3543_v38  ;;  %v1634_v29 = vmul.f32 0.7072136, %v1602_v43 }
 0x4e8   :  { %v1635_v49 = vmul.f32 0.7072136, %v1603_v58  ;;  %1660 = vst [vmem:[#allocation8 + $0x80] sm:$0xff] %v1628_v59  ;;  %1661 = vst [vmem:[#allocation8 + $0x88] sm:$0xff] %v1629_v47  ;;  %v1636_v13 = vmul.f32 0.7072136, %v1604_v39 }
 0x4e9   :  { %v1637_v21 = vmul.f32 0.7072136, %v1605_v53  ;;  %v1638_v26 = vmul.f32 0.7072136, %v1606_v11  ;;  %1662 = vst [vmem:[#allocation8 + $0x90] sm:$0xff] %v1630_v6  ;;  %1663 = vst [vmem:[#allocation8 + $0x98] sm:$0xff] %v1631_v34 }
 0x4ea   :  { %1664 = vst [vmem:[#allocation8 + $0xa0] sm:$0xff] %v1632_v15  ;;  %v1639_v55 = vmul.f32 0.7072136, %v1607_v24  ;;  %v1640_v18 = vmul.f32 0.7072136, %v1608_v46  ;;  %1665 = vst [vmem:[#allocation8 + $0xa8] sm:$0xff] %v1633_v1 }
 0x4eb   :  { %v1641_v45 = vmul.f32 0.7072136, %v1609_v16  ;;  %1666 = vst [vmem:[#allocation8 + $0xb0] sm:$0xff] %v1634_v29  ;;  %1667 = vst [vmem:[#allocation8 + $0xb8] sm:$0xff] %v1635_v49  ;;  %v1642_v30 = vmul.f32 0.7072136, %v1610_v63 }
 0x4ec   :  { %v1643_v9 = vmul.f32 0.7072136, %v1611_v20  ;;  %1668 = vst [vmem:[#allocation8 + $0xc0] sm:$0xff] %v1636_v13  ;;  %1669 = vst [vmem:[#allocation8 + $0xc8] sm:$0xff] %v1637_v21 }
 0x4ed   :  { %1670 = vst [vmem:[#allocation8 + $0xd0] sm:$0xff] %v1638_v26  ;;  %1671 = vst [vmem:[#allocation8 + $0xd8] sm:$0xff] %v1639_v55 }
 0x4ee   :  { %1672 = vst [vmem:[#allocation8 + $0xe0] sm:$0xff] %v1640_v18  ;;  %1673 = vst [vmem:[#allocation8 + $0xe8] sm:$0xff] %v1641_v45 }
 0x4ef   :  { %1674 = vst [vmem:[#allocation8 + $0xf0] sm:$0xff] %v1642_v30  ;;  %1675 = vst [vmem:[#allocation8 + $0xf8] sm:$0xff] %v1643_v9 }
 0x4f0   :  { %2338 = shalt.err (!%p2335_p5)
}
 0x4f1   :  { %1687 = dma.vmem_to_hbm [thread:$0]  %s1682_s30, 4096, %s3586_s9, [#allocation4], %s2355_s14, %s2355_s14, %s2356_s15  }
 0x4f2   :  { %2351 = dma.done.wait [#allocation4], 4096  }
 0x4f3   :  { %2352 = vsyncadd [#allocation4], 4294963200 }
 0x4f4   :  { %1691 = vsyncpa [#allocation3], 1 }
 0x4f5   :  { %1692 = vsyncpa [#allocation6], 1 }
 0x4f6   :  { %1693 = vsyncpa [#allocation4], 1 }

</bundles_post_ra>
